<compile_context>
chip_gen: v7x
topology: tpu7x:2x2x1
jax: 0.10.0
libtpu: 0.0.40
codegen_flags: <defaults>
</compile_context>

<pallas_src>
import numpy as np
import jax
import jax.numpy as jnp
from jax.experimental import pallas as pl
from jax.experimental.pallas import tpu as pltpu


def _make_lstm_kernel(T, B_pad, H):
    """Builds the kernel with T/B_pad/H baked in as Python constants."""
    FULL_VREG_GATES = (4 * H) <= 128   # gates fit one vreg lane-wise

    def kernel(x_ref,        # (T*B_pad, Din)  bf16   time-major, flattened, batch-padded
               wih0_ref,     # (Din, 4H)       bf16
               whh0_ref,     # (H,   4H)       bf16
               b0_ref,       # (1,   4H)       f32    bih0 + bhh0
               wih1_ref,     # (H,   4H)       bf16
               whh1_ref,     # (H,   4H)       bf16
               b1_ref,       # (1,   4H)       f32    bih1 + bhh1
               wlin_ref,     # (H,   1)        bf16
               blin_ref,     # (1,   1)        f32
               out_ref):     # (T*B_pad, 1)    f32
        # ---- hoisted layer-0 input projection: one dense MXU matmul -------
        x0 = jnp.dot(x_ref[...], wih0_ref[...],
                     preferred_element_type=jnp.float32) + b0_ref[...]   # (T*B_pad, 4H) f32

        whh0 = whh0_ref[...]
        wih1 = wih1_ref[...]
        whh1 = whh1_ref[...]

        # hoisted bias broadcast (JAX does not CSE broadcast_in_dim)
        b1b = jnp.broadcast_to(b1_ref[...], (B_pad, 4 * H))              # (B_pad, 4H) f32

        def gates_to_hc(gates, c):
            if FULL_VREG_GATES:
                # full-vreg transcendentals, then static lane slices (2 EUP pushes)
                sg = jax.nn.sigmoid(gates)
                tg = jnp.tanh(gates)
                i_g = sg[:, 0 * H:1 * H]
                f_g = sg[:, 1 * H:2 * H]
                g_g = tg[:, 2 * H:3 * H]
                o_g = sg[:, 3 * H:4 * H]
            else:
                # gates span multiple vregs: only touch the lanes each gate needs
                if_g = jax.nn.sigmoid(gates[:, 0:2 * H])
                i_g = if_g[:, 0:H]
                f_g = if_g[:, H:2 * H]
                g_g = jnp.tanh(gates[:, 2 * H:3 * H])
                o_g = jax.nn.sigmoid(gates[:, 3 * H:4 * H])
            c_new = f_g * c + i_g * g_g
            h_new = o_g * jnp.tanh(c_new)
            return h_new, c_new

        zeros = jnp.zeros((B_pad, H), jnp.float32)
        h0, c0, h1, c1 = zeros, zeros, zeros, zeros
        h1_steps = []

        # ---- fully unrolled recurrence (T static & small) ------------------
        # For T beyond ~16: write each h1 into a pltpu.VMEM((T*B_pad, H), f32)
        # scratch slab at a static sublane offset and use lax.fori_loop(unroll=4..8)
        # instead of a Python list, to cap vreg pressure.
        for t in range(T):
            # layer-1 recurrent term first: depends only on h1_{t-1}, so it can
            # overlap with layer-0's step-t cell (split matmul, no concat).
            g1_rec = jnp.dot(h1.astype(jnp.bfloat16), whh1,
                             preferred_element_type=jnp.float32)

            # layer 0: hoisted input term (free tile-aligned view) + recurrent term
            g0 = x0[t * B_pad:(t + 1) * B_pad, :] + jnp.dot(
                h0.astype(jnp.bfloat16), whh0, preferred_element_type=jnp.float32)
            h0, c0 = gates_to_hc(g0, c0)

            # layer 1: input term on fresh h0, add precomputed recurrent term + bias
            g1 = jnp.dot(h0.astype(jnp.bfloat16), wih1,
                         preferred_element_type=jnp.float32) + g1_rec + b1b
            h1, c1 = gates_to_hc(g1, c1)
            h1_steps.append(h1)

        # ---- hoisted Linear head: one matmul + one store -------------------
        # (sublane-aligned pieces -> cheap concat; lane-dense output only matters
        #  once T*B is large)
        stack = jnp.concatenate(h1_steps, axis=0).astype(jnp.bfloat16)   # (T*B_pad, H)
        pred = jnp.dot(stack, wlin_ref[...],
                       preferred_element_type=jnp.float32) + blin_ref[...]
        out_ref[...] = pred

    return kernel


def _vmem_budget_bytes(T, B_pad, Din, H):
    """Explicit scoped-VMEM budget sized to the actual slabs (with headroom)."""
    x_in = T * B_pad * Din * 2                       # bf16 input slab
    x0 = T * B_pad * 4 * H * 4                       # f32 hoisted projection
    slab = T * B_pad * H * (4 + 2)                   # h1 stack f32 + bf16 copy
    w = (Din + 3 * H) * 4 * H * 2 + H * 2 + 4 * 4 * H
    out = T * B_pad * 4
    state = 4 * B_pad * H * 4
    total = 2 * (x_in + x0 + slab + w + out + state)  # 2x headroom / buffering
    return int(min(max(total, 4 << 20), 64 << 20))    # fits v7x's 64 MiB physical


def lstm_forward(x, params):
    """x: (B, T, Din) batch-first, like the PyTorch module.  Returns (B, T, 1)."""
    B, T, Din = x.shape
    H = params["whh0"].shape[1]
    bf16 = jnp.bfloat16
    f32 = jnp.float32

    # pad batch to the f32 sublane tile (8) so per-step slices are free views
    B_pad = max(8, ((B + 7) // 8) * 8)

    # Glue: transpose weights, fuse PyTorch's two biases per layer, cast MXU
    # operands to bf16.  Layer-1 matmul is kept SPLIT (two weight mats).
    wih0_t = params["wih0"].T.astype(bf16)                                  # (Din, 4H)
    whh0_t = params["whh0"].T.astype(bf16)                                  # (H, 4H)
    b0 = (params["bih0"] + params["bhh0"]).reshape(1, 4 * H).astype(f32)    # (1, 4H)
    wih1_t = params["wih1"].T.astype(bf16)                                  # (H, 4H)
    whh1_t = params["whh1"].T.astype(bf16)                                  # (H, 4H)
    b1 = (params["bih1"] + params["bhh1"]).reshape(1, 4 * H).astype(f32)    # (1, 4H)
    wlin_t = params["wlin"].T.astype(bf16)                                  # (H, 1)
    blin = params["blin"].reshape(1, 1).astype(f32)                         # (1, 1)

    # pad batch (zero rows 是 computed but dropped), then time-major flatten:
    # row t*B_pad + b  <->  (t, b)
    if B_pad != B:
        x_pad = jnp.zeros((B_pad, T, Din), x.dtype).at[:B].set(x)
    else:
        x_pad = x
    x_tm = jnp.transpose(x_pad, (1, 0, 2)).reshape(T * B_pad, Din).astype(bf16)

    vmem = pl.BlockSpec(memory_space=pltpu.MemorySpace.VMEM)
    out = pl.pallas_call(
        _make_lstm_kernel(T, B_pad, H),
        out_shape=jax.ShapeDtypeStruct((T * B_pad, 1), jnp.float32),
        in_specs=[vmem] * 9,
        out_specs=vmem,
        compiler_params=pltpu.CompilerParams(
            vmem_limit_bytes=_vmem_budget_bytes(T, B_pad, Din, H)),
    )(x_tm, wih0_t, whh0_t, b0, wih1_t, whh1_t, b1, wlin_t, blin)

    # (T*B_pad, 1) -> (B, T, 1); drop padded batch rows
    return jnp.transpose(out.reshape(T, B_pad, 1), (1, 0, 2))[:B]


def _reference(x, params):
    """Pure-JAX f32 reference of torch.nn.LSTM(2 layers, batch_first) + Linear."""
    B, T, Din = x.shape
    H = params["whh0"].shape[1]

    def cell(x_in, h, c, wih, whh, bih, bhh):
        gates = x_in @ wih.T + bih + h @ whh.T + bhh
        i = jax.nn.sigmoid(gates[:, 0 * H:1 * H])
        f = jax.nn.sigmoid(gates[:, 1 * H:2 * H])
        g = jnp.tanh(gates[:, 2 * H:3 * H])
        o = jax.nn.sigmoid(gates[:, 3 * H:4 * H])
        c = f * c + i * g
        h = o * jnp.tanh(c)
        return h, c

    h0 = c0 = h1 = c1 = jnp.zeros((B, H), jnp.float32)
    outs = []
    for t in range(T):
        h0, c0 = cell(x[:, t, :], h0, c0, params["wih0"], params["whh0"],
                      params["bih0"], params["bhh0"])
        h1, c1 = cell(h0, h1, c1, params["wih1"], params["whh1"],
                      params["bih1"], params["bhh1"])
        outs.append(h1 @ params["wlin"].T + params["blin"])
    return jnp.stack(outs, axis=1)                                          # (B, T, 1)


def init_params(key, input_size, hidden_size, output_size=1):
    """Deterministic init mirroring PyTorch shapes: uniform(-1/sqrt(H), 1/sqrt(H))."""
    k = 1.0 / np.sqrt(hidden_size)
    keys = jax.random.split(key, 10)
    u = lambda kk, shape: jax.random.uniform(kk, shape, jnp.float32, -k, k)
    H4 = 4 * hidden_size
    return {
        "wih0": u(keys[0], (H4, input_size)),
        "whh0": u(keys[1], (H4, hidden_size)),
        "bih0": u(keys[2], (H4,)),
        "bhh0": u(keys[3], (H4,)),
        "wih1": u(keys[4], (H4, hidden_size)),
        "whh1": u(keys[5], (H4, hidden_size)),
        "bih1": u(keys[6], (H4,)),
        "bhh1": u(keys[7], (H4,)),
        "wlin": u(keys[8], (output_size, hidden_size)),
        "blin": u(keys[9], (output_size,)),
    }


if __name__ == "__main__":
    B, T, INPUT, HIDDEN, OUT = 2, 8, 4, 32, 1

    key = jax.random.PRNGKey(0)
    kx, kp = jax.random.split(key)
    x = jax.random.normal(kx, (B, T, INPUT), jnp.float32)
    params = init_params(kp, INPUT, HIDDEN, OUT)

    pred = lstm_forward(x, params)
    pred = jax.block_until_ready(pred)

    ref = _reference(x, params)
    assert pred.shape == (B, T, OUT)
    # bf16 MXU operands (f32 accumulation / f32 recurrent state) -> relaxed,
    # T-dependent tolerance (rounding of the recurrent bf16 cast compounds with T).
    np.testing.assert_allclose(np.asarray(pred), np.asarray(ref),
                               rtol=2e-2, atol=2e-2)
    print("KERNEL_OK")
</pallas_src>

<mosaic_0001>
module attributes {stable_mosaic.version = 11 : i64} {
  func.func @kernel(%arg0: memref<64x4xbf16, #tpu.memory_space<vmem>>, %arg1: memref<4x128xbf16, #tpu.memory_space<vmem>>, %arg2: memref<32x128xbf16, #tpu.memory_space<vmem>>, %arg3: memref<1x128xf32, #tpu.memory_space<vmem>>, %arg4: memref<32x128xbf16, #tpu.memory_space<vmem>>, %arg5: memref<32x128xbf16, #tpu.memory_space<vmem>>, %arg6: memref<1x128xf32, #tpu.memory_space<vmem>>, %arg7: memref<32x1xbf16, #tpu.memory_space<vmem>>, %arg8: memref<1x1xf32, #tpu.memory_space<vmem>>, %arg9: memref<64x1xf32, #tpu.memory_space<vmem>>) attributes {dimension_semantics = [], scalar_prefetch = 0 : i64, scratch_operands = 0 : i64, tpu.core_type = #tpu.core_type<tc>} {
    %c0 = arith.constant 0 : index
    %c0_0 = arith.constant 0 : index
    %0 = vector.load %arg0[%c0, %c0_0] : memref<64x4xbf16, #tpu.memory_space<vmem>>, vector<64x4xbf16>
    %c0_1 = arith.constant 0 : index
    %c0_2 = arith.constant 0 : index
    %1 = vector.load %arg1[%c0_1, %c0_2] : memref<4x128xbf16, #tpu.memory_space<vmem>>, vector<4x128xbf16>
    %cst = arith.constant dense<0.000000e+00> : vector<64x128xf32>
    %2 = tpu.matmul %0, %1, %cst {dimension_numbers = #tpu.dot_dimension_numbers<[1], [0], [0], [1], [0, 0, 1, 1], [], []>} : vector<64x4xbf16>, vector<4x128xbf16>, vector<64x128xf32> -> vector<64x128xf32>
    %c0_3 = arith.constant 0 : index
    %c0_4 = arith.constant 0 : index
    %3 = vector.load %arg3[%c0_3, %c0_4] : memref<1x128xf32, #tpu.memory_space<vmem>>, vector<1x128xf32>
    %4 = vector.broadcast %3 : vector<1x128xf32> to vector<64x128xf32>
    %5 = arith.addf %2, %4 : vector<64x128xf32>
    %c0_5 = arith.constant 0 : index
    %c0_6 = arith.constant 0 : index
    %6 = vector.load %arg2[%c0_5, %c0_6] : memref<32x128xbf16, #tpu.memory_space<vmem>>, vector<32x128xbf16>
    %c0_7 = arith.constant 0 : index
    %c0_8 = arith.constant 0 : index
    %7 = vector.load %arg4[%c0_7, %c0_8] : memref<32x128xbf16, #tpu.memory_space<vmem>>, vector<32x128xbf16>
    %c0_9 = arith.constant 0 : index
    %c0_10 = arith.constant 0 : index
    %8 = vector.load %arg5[%c0_9, %c0_10] : memref<32x128xbf16, #tpu.memory_space<vmem>>, vector<32x128xbf16>
    %c0_11 = arith.constant 0 : index
    %c0_12 = arith.constant 0 : index
    %9 = vector.load %arg6[%c0_11, %c0_12] : memref<1x128xf32, #tpu.memory_space<vmem>>, vector<1x128xf32>
    %10 = vector.shape_cast %9 : vector<1x128xf32> to vector<1x128xf32>
    %11 = vector.broadcast %10 : vector<1x128xf32> to vector<8x128xf32>
    %cst_13 = arith.constant 0.000000e+00 : f32
    %12 = vector.broadcast %cst_13 : f32 to vector<8x32xf32>
    %13 = arith.truncf %12 : vector<8x32xf32> to vector<8x32xbf16>
    %cst_14 = arith.constant dense<0.000000e+00> : vector<8x128xf32>
    %14 = tpu.matmul %13, %8, %cst_14 {dimension_numbers = #tpu.dot_dimension_numbers<[1], [0], [0], [1], [0, 0, 1, 1], [], []>} : vector<8x32xbf16>, vector<32x128xbf16>, vector<8x128xf32> -> vector<8x128xf32>
    %15 = vector.extract_strided_slice %5 {offsets = [0, 0], sizes = [8, 128], strides = [1, 1]} : vector<64x128xf32> to vector<8x128xf32>
    %16 = arith.truncf %12 : vector<8x32xf32> to vector<8x32xbf16>
    %cst_15 = arith.constant dense<0.000000e+00> : vector<8x128xf32>
    %17 = tpu.matmul %16, %6, %cst_15 {dimension_numbers = #tpu.dot_dimension_numbers<[1], [0], [0], [1], [0, 0, 1, 1], [], []>} : vector<8x32xbf16>, vector<32x128xbf16>, vector<8x128xf32> -> vector<8x128xf32>
    %18 = arith.addf %15, %17 : vector<8x128xf32>
    %19 = arith.negf %18 : vector<8x128xf32>
    %20 = math.exp %19 : vector<8x128xf32>
    %cst_16 = arith.constant 1.000000e+00 : f32
    %21 = vector.broadcast %cst_16 : f32 to vector<8x128xf32>
    %22 = arith.addf %21, %20 : vector<8x128xf32>
    %23 = arith.divf %21, %22 : vector<8x128xf32>
    %24 = math.tanh %18 : vector<8x128xf32>
    %25 = vector.extract_strided_slice %23 {offsets = [0, 0], sizes = [8, 32], strides = [1, 1]} : vector<8x128xf32> to vector<8x32xf32>
    %26 = vector.extract_strided_slice %23 {offsets = [0, 32], sizes = [8, 32], strides = [1, 1]} : vector<8x128xf32> to vector<8x32xf32>
    %27 = vector.extract_strided_slice %24 {offsets = [0, 64], sizes = [8, 32], strides = [1, 1]} : vector<8x128xf32> to vector<8x32xf32>
    %28 = vector.extract_strided_slice %23 {offsets = [0, 96], sizes = [8, 32], strides = [1, 1]} : vector<8x128xf32> to vector<8x32xf32>
    %29 = arith.mulf %26, %12 : vector<8x32xf32>
    %30 = arith.mulf %25, %27 : vector<8x32xf32>
    %31 = arith.addf %29, %30 : vector<8x32xf32>
    %32 = math.tanh %31 : vector<8x32xf32>
    %33 = arith.mulf %28, %32 : vector<8x32xf32>
    %34 = arith.truncf %33 : vector<8x32xf32> to vector<8x32xbf16>
    %cst_17 = arith.constant dense<0.000000e+00> : vector<8x128xf32>
    %35 = tpu.matmul %34, %7, %cst_17 {dimension_numbers = #tpu.dot_dimension_numbers<[1], [0], [0], [1], [0, 0, 1, 1], [], []>} : vector<8x32xbf16>, vector<32x128xbf16>, vector<8x128xf32> -> vector<8x128xf32>
    %36 = arith.addf %35, %14 : vector<8x128xf32>
    %37 = arith.addf %36, %11 : vector<8x128xf32>
    %38 = arith.negf %37 : vector<8x128xf32>
    %39 = math.exp %38 : vector<8x128xf32>
    %cst_18 = arith.constant 1.000000e+00 : f32
    %40 = vector.broadcast %cst_18 : f32 to vector<8x128xf32>
    %41 = arith.addf %40, %39 : vector<8x128xf32>
    %42 = arith.divf %40, %41 : vector<8x128xf32>
    %43 = math.tanh %37 : vector<8x128xf32>
    %44 = vector.extract_strided_slice %42 {offsets = [0, 0], sizes = [8, 32], strides = [1, 1]} : vector<8x128xf32> to vector<8x32xf32>
    %45 = vector.extract_strided_slice %42 {offsets = [0, 32], sizes = [8, 32], strides = [1, 1]} : vector<8x128xf32> to vector<8x32xf32>
    %46 = vector.extract_strided_slice %43 {offsets = [0, 64], sizes = [8, 32], strides = [1, 1]} : vector<8x128xf32> to vector<8x32xf32>
    %47 = vector.extract_strided_slice %42 {offsets = [0, 96], sizes = [8, 32], strides = [1, 1]} : vector<8x128xf32> to vector<8x32xf32>
    %48 = arith.mulf %45, %12 : vector<8x32xf32>
    %49 = arith.mulf %44, %46 : vector<8x32xf32>
    %50 = arith.addf %48, %49 : vector<8x32xf32>
    %51 = math.tanh %50 : vector<8x32xf32>
    %52 = arith.mulf %47, %51 : vector<8x32xf32>
    %53 = arith.truncf %52 : vector<8x32xf32> to vector<8x32xbf16>
    %cst_19 = arith.constant dense<0.000000e+00> : vector<8x128xf32>
    %54 = tpu.matmul %53, %8, %cst_19 {dimension_numbers = #tpu.dot_dimension_numbers<[1], [0], [0], [1], [0, 0, 1, 1], [], []>} : vector<8x32xbf16>, vector<32x128xbf16>, vector<8x128xf32> -> vector<8x128xf32>
    %55 = vector.extract_strided_slice %5 {offsets = [8, 0], sizes = [8, 128], strides = [1, 1]} : vector<64x128xf32> to vector<8x128xf32>
    %56 = arith.truncf %33 : vector<8x32xf32> to vector<8x32xbf16>
    %cst_20 = arith.constant dense<0.000000e+00> : vector<8x128xf32>
    %57 = tpu.matmul %56, %6, %cst_20 {dimension_numbers = #tpu.dot_dimension_numbers<[1], [0], [0], [1], [0, 0, 1, 1], [], []>} : vector<8x32xbf16>, vector<32x128xbf16>, vector<8x128xf32> -> vector<8x128xf32>
    %58 = arith.addf %55, %57 : vector<8x128xf32>
    %59 = arith.negf %58 : vector<8x128xf32>
    %60 = math.exp %59 : vector<8x128xf32>
    %cst_21 = arith.constant 1.000000e+00 : f32
    %61 = vector.broadcast %cst_21 : f32 to vector<8x128xf32>
    %62 = arith.addf %61, %60 : vector<8x128xf32>
    %63 = arith.divf %61, %62 : vector<8x128xf32>
    %64 = math.tanh %58 : vector<8x128xf32>
    %65 = vector.extract_strided_slice %63 {offsets = [0, 0], sizes = [8, 32], strides = [1, 1]} : vector<8x128xf32> to vector<8x32xf32>
    %66 = vector.extract_strided_slice %63 {offsets = [0, 32], sizes = [8, 32], strides = [1, 1]} : vector<8x128xf32> to vector<8x32xf32>
    %67 = vector.extract_strided_slice %64 {offsets = [0, 64], sizes = [8, 32], strides = [1, 1]} : vector<8x128xf32> to vector<8x32xf32>
    %68 = vector.extract_strided_slice %63 {offsets = [0, 96], sizes = [8, 32], strides = [1, 1]} : vector<8x128xf32> to vector<8x32xf32>
    %69 = arith.mulf %66, %31 : vector<8x32xf32>
    %70 = arith.mulf %65, %67 : vector<8x32xf32>
    %71 = arith.addf %69, %70 : vector<8x32xf32>
    %72 = math.tanh %71 : vector<8x32xf32>
    %73 = arith.mulf %68, %72 : vector<8x32xf32>
    %74 = arith.truncf %73 : vector<8x32xf32> to vector<8x32xbf16>
    %cst_22 = arith.constant dense<0.000000e+00> : vector<8x128xf32>
    %75 = tpu.matmul %74, %7, %cst_22 {dimension_numbers = #tpu.dot_dimension_numbers<[1], [0], [0], [1], [0, 0, 1, 1], [], []>} : vector<8x32xbf16>, vector<32x128xbf16>, vector<8x128xf32> -> vector<8x128xf32>
    %76 = arith.addf %75, %54 : vector<8x128xf32>
    %77 = arith.addf %76, %11 : vector<8x128xf32>
    %78 = arith.negf %77 : vector<8x128xf32>
    %79 = math.exp %78 : vector<8x128xf32>
    %cst_23 = arith.constant 1.000000e+00 : f32
    %80 = vector.broadcast %cst_23 : f32 to vector<8x128xf32>
    %81 = arith.addf %80, %79 : vector<8x128xf32>
    %82 = arith.divf %80, %81 : vector<8x128xf32>
    %83 = math.tanh %77 : vector<8x128xf32>
    %84 = vector.extract_strided_slice %82 {offsets = [0, 0], sizes = [8, 32], strides = [1, 1]} : vector<8x128xf32> to vector<8x32xf32>
    %85 = vector.extract_strided_slice %82 {offsets = [0, 32], sizes = [8, 32], strides = [1, 1]} : vector<8x128xf32> to vector<8x32xf32>
    %86 = vector.extract_strided_slice %83 {offsets = [0, 64], sizes = [8, 32], strides = [1, 1]} : vector<8x128xf32> to vector<8x32xf32>
    %87 = vector.extract_strided_slice %82 {offsets = [0, 96], sizes = [8, 32], strides = [1, 1]} : vector<8x128xf32> to vector<8x32xf32>
    %88 = arith.mulf %85, %50 : vector<8x32xf32>
    %89 = arith.mulf %84, %86 : vector<8x32xf32>
    %90 = arith.addf %88, %89 : vector<8x32xf32>
    %91 = math.tanh %90 : vector<8x32xf32>
    %92 = arith.mulf %87, %91 : vector<8x32xf32>
    %93 = arith.truncf %92 : vector<8x32xf32> to vector<8x32xbf16>
    %cst_24 = arith.constant dense<0.000000e+00> : vector<8x128xf32>
    %94 = tpu.matmul %93, %8, %cst_24 {dimension_numbers = #tpu.dot_dimension_numbers<[1], [0], [0], [1], [0, 0, 1, 1], [], []>} : vector<8x32xbf16>, vector<32x128xbf16>, vector<8x128xf32> -> vector<8x128xf32>
    %95 = vector.extract_strided_slice %5 {offsets = [16, 0], sizes = [8, 128], strides = [1, 1]} : vector<64x128xf32> to vector<8x128xf32>
    %96 = arith.truncf %73 : vector<8x32xf32> to vector<8x32xbf16>
    %cst_25 = arith.constant dense<0.000000e+00> : vector<8x128xf32>
    %97 = tpu.matmul %96, %6, %cst_25 {dimension_numbers = #tpu.dot_dimension_numbers<[1], [0], [0], [1], [0, 0, 1, 1], [], []>} : vector<8x32xbf16>, vector<32x128xbf16>, vector<8x128xf32> -> vector<8x128xf32>
    %98 = arith.addf %95, %97 : vector<8x128xf32>
    %99 = arith.negf %98 : vector<8x128xf32>
    %100 = math.exp %99 : vector<8x128xf32>
    %cst_26 = arith.constant 1.000000e+00 : f32
    %101 = vector.broadcast %cst_26 : f32 to vector<8x128xf32>
    %102 = arith.addf %101, %100 : vector<8x128xf32>
    %103 = arith.divf %101, %102 : vector<8x128xf32>
    %104 = math.tanh %98 : vector<8x128xf32>
    %105 = vector.extract_strided_slice %103 {offsets = [0, 0], sizes = [8, 32], strides = [1, 1]} : vector<8x128xf32> to vector<8x32xf32>
    %106 = vector.extract_strided_slice %103 {offsets = [0, 32], sizes = [8, 32], strides = [1, 1]} : vector<8x128xf32> to vector<8x32xf32>
    %107 = vector.extract_strided_slice %104 {offsets = [0, 64], sizes = [8, 32], strides = [1, 1]} : vector<8x128xf32> to vector<8x32xf32>
    %108 = vector.extract_strided_slice %103 {offsets = [0, 96], sizes = [8, 32], strides = [1, 1]} : vector<8x128xf32> to vector<8x32xf32>
    %109 = arith.mulf %106, %71 : vector<8x32xf32>
    %110 = arith.mulf %105, %107 : vector<8x32xf32>
    %111 = arith.addf %109, %110 : vector<8x32xf32>
    %112 = math.tanh %111 : vector<8x32xf32>
    %113 = arith.mulf %108, %112 : vector<8x32xf32>
    %114 = arith.truncf %113 : vector<8x32xf32> to vector<8x32xbf16>
    %cst_27 = arith.constant dense<0.000000e+00> : vector<8x128xf32>
    %115 = tpu.matmul %114, %7, %cst_27 {dimension_numbers = #tpu.dot_dimension_numbers<[1], [0], [0], [1], [0, 0, 1, 1], [], []>} : vector<8x32xbf16>, vector<32x128xbf16>, vector<8x128xf32> -> vector<8x128xf32>
    %116 = arith.addf %115, %94 : vector<8x128xf32>
    %117 = arith.addf %116, %11 : vector<8x128xf32>
    %118 = arith.negf %117 : vector<8x128xf32>
    %119 = math.exp %118 : vector<8x128xf32>
    %cst_28 = arith.constant 1.000000e+00 : f32
    %120 = vector.broadcast %cst_28 : f32 to vector<8x128xf32>
    %121 = arith.addf %120, %119 : vector<8x128xf32>
    %122 = arith.divf %120, %121 : vector<8x128xf32>
    %123 = math.tanh %117 : vector<8x128xf32>
    %124 = vector.extract_strided_slice %122 {offsets = [0, 0], sizes = [8, 32], strides = [1, 1]} : vector<8x128xf32> to vector<8x32xf32>
    %125 = vector.extract_strided_slice %122 {offsets = [0, 32], sizes = [8, 32], strides = [1, 1]} : vector<8x128xf32> to vector<8x32xf32>
    %126 = vector.extract_strided_slice %123 {offsets = [0, 64], sizes = [8, 32], strides = [1, 1]} : vector<8x128xf32> to vector<8x32xf32>
    %127 = vector.extract_strided_slice %122 {offsets = [0, 96], sizes = [8, 32], strides = [1, 1]} : vector<8x128xf32> to vector<8x32xf32>
    %128 = arith.mulf %125, %90 : vector<8x32xf32>
    %129 = arith.mulf %124, %126 : vector<8x32xf32>
    %130 = arith.addf %128, %129 : vector<8x32xf32>
    %131 = math.tanh %130 : vector<8x32xf32>
    %132 = arith.mulf %127, %131 : vector<8x32xf32>
    %133 = arith.truncf %132 : vector<8x32xf32> to vector<8x32xbf16>
    %cst_29 = arith.constant dense<0.000000e+00> : vector<8x128xf32>
    %134 = tpu.matmul %133, %8, %cst_29 {dimension_numbers = #tpu.dot_dimension_numbers<[1], [0], [0], [1], [0, 0, 1, 1], [], []>} : vector<8x32xbf16>, vector<32x128xbf16>, vector<8x128xf32> -> vector<8x128xf32>
    %135 = vector.extract_strided_slice %5 {offsets = [24, 0], sizes = [8, 128], strides = [1, 1]} : vector<64x128xf32> to vector<8x128xf32>
    %136 = arith.truncf %113 : vector<8x32xf32> to vector<8x32xbf16>
    %cst_30 = arith.constant dense<0.000000e+00> : vector<8x128xf32>
    %137 = tpu.matmul %136, %6, %cst_30 {dimension_numbers = #tpu.dot_dimension_numbers<[1], [0], [0], [1], [0, 0, 1, 1], [], []>} : vector<8x32xbf16>, vector<32x128xbf16>, vector<8x128xf32> -> vector<8x128xf32>
    %138 = arith.addf %135, %137 : vector<8x128xf32>
    %139 = arith.negf %138 : vector<8x128xf32>
    %140 = math.exp %139 : vector<8x128xf32>
    %cst_31 = arith.constant 1.000000e+00 : f32
    %141 = vector.broadcast %cst_31 : f32 to vector<8x128xf32>
    %142 = arith.addf %141, %140 : vector<8x128xf32>
    %143 = arith.divf %141, %142 : vector<8x128xf32>
    %144 = math.tanh %138 : vector<8x128xf32>
    %145 = vector.extract_strided_slice %143 {offsets = [0, 0], sizes = [8, 32], strides = [1, 1]} : vector<8x128xf32> to vector<8x32xf32>
    %146 = vector.extract_strided_slice %143 {offsets = [0, 32], sizes = [8, 32], strides = [1, 1]} : vector<8x128xf32> to vector<8x32xf32>
    %147 = vector.extract_strided_slice %144 {offsets = [0, 64], sizes = [8, 32], strides = [1, 1]} : vector<8x128xf32> to vector<8x32xf32>
    %148 = vector.extract_strided_slice %143 {offsets = [0, 96], sizes = [8, 32], strides = [1, 1]} : vector<8x128xf32> to vector<8x32xf32>
    %149 = arith.mulf %146, %111 : vector<8x32xf32>
    %150 = arith.mulf %145, %147 : vector<8x32xf32>
    %151 = arith.addf %149, %150 : vector<8x32xf32>
    %152 = math.tanh %151 : vector<8x32xf32>
    %153 = arith.mulf %148, %152 : vector<8x32xf32>
    %154 = arith.truncf %153 : vector<8x32xf32> to vector<8x32xbf16>
    %cst_32 = arith.constant dense<0.000000e+00> : vector<8x128xf32>
    %155 = tpu.matmul %154, %7, %cst_32 {dimension_numbers = #tpu.dot_dimension_numbers<[1], [0], [0], [1], [0, 0, 1, 1], [], []>} : vector<8x32xbf16>, vector<32x128xbf16>, vector<8x128xf32> -> vector<8x128xf32>
    %156 = arith.addf %155, %134 : vector<8x128xf32>
    %157 = arith.addf %156, %11 : vector<8x128xf32>
    %158 = arith.negf %157 : vector<8x128xf32>
    %159 = math.exp %158 : vector<8x128xf32>
    %cst_33 = arith.constant 1.000000e+00 : f32
    %160 = vector.broadcast %cst_33 : f32 to vector<8x128xf32>
    %161 = arith.addf %160, %159 : vector<8x128xf32>
    %162 = arith.divf %160, %161 : vector<8x128xf32>
    %163 = math.tanh %157 : vector<8x128xf32>
    %164 = vector.extract_strided_slice %162 {offsets = [0, 0], sizes = [8, 32], strides = [1, 1]} : vector<8x128xf32> to vector<8x32xf32>
    %165 = vector.extract_strided_slice %162 {offsets = [0, 32], sizes = [8, 32], strides = [1, 1]} : vector<8x128xf32> to vector<8x32xf32>
    %166 = vector.extract_strided_slice %163 {offsets = [0, 64], sizes = [8, 32], strides = [1, 1]} : vector<8x128xf32> to vector<8x32xf32>
    %167 = vector.extract_strided_slice %162 {offsets = [0, 96], sizes = [8, 32], strides = [1, 1]} : vector<8x128xf32> to vector<8x32xf32>
    %168 = arith.mulf %165, %130 : vector<8x32xf32>
    %169 = arith.mulf %164, %166 : vector<8x32xf32>
    %170 = arith.addf %168, %169 : vector<8x32xf32>
    %171 = math.tanh %170 : vector<8x32xf32>
    %172 = arith.mulf %167, %171 : vector<8x32xf32>
    %173 = arith.truncf %172 : vector<8x32xf32> to vector<8x32xbf16>
    %cst_34 = arith.constant dense<0.000000e+00> : vector<8x128xf32>
    %174 = tpu.matmul %173, %8, %cst_34 {dimension_numbers = #tpu.dot_dimension_numbers<[1], [0], [0], [1], [0, 0, 1, 1], [], []>} : vector<8x32xbf16>, vector<32x128xbf16>, vector<8x128xf32> -> vector<8x128xf32>
    %175 = vector.extract_strided_slice %5 {offsets = [32, 0], sizes = [8, 128], strides = [1, 1]} : vector<64x128xf32> to vector<8x128xf32>
    %176 = arith.truncf %153 : vector<8x32xf32> to vector<8x32xbf16>
    %cst_35 = arith.constant dense<0.000000e+00> : vector<8x128xf32>
    %177 = tpu.matmul %176, %6, %cst_35 {dimension_numbers = #tpu.dot_dimension_numbers<[1], [0], [0], [1], [0, 0, 1, 1], [], []>} : vector<8x32xbf16>, vector<32x128xbf16>, vector<8x128xf32> -> vector<8x128xf32>
    %178 = arith.addf %175, %177 : vector<8x128xf32>
    %179 = arith.negf %178 : vector<8x128xf32>
    %180 = math.exp %179 : vector<8x128xf32>
    %cst_36 = arith.constant 1.000000e+00 : f32
    %181 = vector.broadcast %cst_36 : f32 to vector<8x128xf32>
    %182 = arith.addf %181, %180 : vector<8x128xf32>
    %183 = arith.divf %181, %182 : vector<8x128xf32>
    %184 = math.tanh %178 : vector<8x128xf32>
    %185 = vector.extract_strided_slice %183 {offsets = [0, 0], sizes = [8, 32], strides = [1, 1]} : vector<8x128xf32> to vector<8x32xf32>
    %186 = vector.extract_strided_slice %183 {offsets = [0, 32], sizes = [8, 32], strides = [1, 1]} : vector<8x128xf32> to vector<8x32xf32>
    %187 = vector.extract_strided_slice %184 {offsets = [0, 64], sizes = [8, 32], strides = [1, 1]} : vector<8x128xf32> to vector<8x32xf32>
    %188 = vector.extract_strided_slice %183 {offsets = [0, 96], sizes = [8, 32], strides = [1, 1]} : vector<8x128xf32> to vector<8x32xf32>
    %189 = arith.mulf %186, %151 : vector<8x32xf32>
    %190 = arith.mulf %185, %187 : vector<8x32xf32>
    %191 = arith.addf %189, %190 : vector<8x32xf32>
    %192 = math.tanh %191 : vector<8x32xf32>
    %193 = arith.mulf %188, %192 : vector<8x32xf32>
    %194 = arith.truncf %193 : vector<8x32xf32> to vector<8x32xbf16>
    %cst_37 = arith.constant dense<0.000000e+00> : vector<8x128xf32>
    %195 = tpu.matmul %194, %7, %cst_37 {dimension_numbers = #tpu.dot_dimension_numbers<[1], [0], [0], [1], [0, 0, 1, 1], [], []>} : vector<8x32xbf16>, vector<32x128xbf16>, vector<8x128xf32> -> vector<8x128xf32>
    %196 = arith.addf %195, %174 : vector<8x128xf32>
    %197 = arith.addf %196, %11 : vector<8x128xf32>
    %198 = arith.negf %197 : vector<8x128xf32>
    %199 = math.exp %198 : vector<8x128xf32>
    %cst_38 = arith.constant 1.000000e+00 : f32
    %200 = vector.broadcast %cst_38 : f32 to vector<8x128xf32>
    %201 = arith.addf %200, %199 : vector<8x128xf32>
    %202 = arith.divf %200, %201 : vector<8x128xf32>
    %203 = math.tanh %197 : vector<8x128xf32>
    %204 = vector.extract_strided_slice %202 {offsets = [0, 0], sizes = [8, 32], strides = [1, 1]} : vector<8x128xf32> to vector<8x32xf32>
    %205 = vector.extract_strided_slice %202 {offsets = [0, 32], sizes = [8, 32], strides = [1, 1]} : vector<8x128xf32> to vector<8x32xf32>
    %206 = vector.extract_strided_slice %203 {offsets = [0, 64], sizes = [8, 32], strides = [1, 1]} : vector<8x128xf32> to vector<8x32xf32>
    %207 = vector.extract_strided_slice %202 {offsets = [0, 96], sizes = [8, 32], strides = [1, 1]} : vector<8x128xf32> to vector<8x32xf32>
    %208 = arith.mulf %205, %170 : vector<8x32xf32>
    %209 = arith.mulf %204, %206 : vector<8x32xf32>
    %210 = arith.addf %208, %209 : vector<8x32xf32>
    %211 = math.tanh %210 : vector<8x32xf32>
    %212 = arith.mulf %207, %211 : vector<8x32xf32>
    %213 = arith.truncf %212 : vector<8x32xf32> to vector<8x32xbf16>
    %cst_39 = arith.constant dense<0.000000e+00> : vector<8x128xf32>
    %214 = tpu.matmul %213, %8, %cst_39 {dimension_numbers = #tpu.dot_dimension_numbers<[1], [0], [0], [1], [0, 0, 1, 1], [], []>} : vector<8x32xbf16>, vector<32x128xbf16>, vector<8x128xf32> -> vector<8x128xf32>
    %215 = vector.extract_strided_slice %5 {offsets = [40, 0], sizes = [8, 128], strides = [1, 1]} : vector<64x128xf32> to vector<8x128xf32>
    %216 = arith.truncf %193 : vector<8x32xf32> to vector<8x32xbf16>
    %cst_40 = arith.constant dense<0.000000e+00> : vector<8x128xf32>
    %217 = tpu.matmul %216, %6, %cst_40 {dimension_numbers = #tpu.dot_dimension_numbers<[1], [0], [0], [1], [0, 0, 1, 1], [], []>} : vector<8x32xbf16>, vector<32x128xbf16>, vector<8x128xf32> -> vector<8x128xf32>
    %218 = arith.addf %215, %217 : vector<8x128xf32>
    %219 = arith.negf %218 : vector<8x128xf32>
    %220 = math.exp %219 : vector<8x128xf32>
    %cst_41 = arith.constant 1.000000e+00 : f32
    %221 = vector.broadcast %cst_41 : f32 to vector<8x128xf32>
    %222 = arith.addf %221, %220 : vector<8x128xf32>
    %223 = arith.divf %221, %222 : vector<8x128xf32>
    %224 = math.tanh %218 : vector<8x128xf32>
    %225 = vector.extract_strided_slice %223 {offsets = [0, 0], sizes = [8, 32], strides = [1, 1]} : vector<8x128xf32> to vector<8x32xf32>
    %226 = vector.extract_strided_slice %223 {offsets = [0, 32], sizes = [8, 32], strides = [1, 1]} : vector<8x128xf32> to vector<8x32xf32>
    %227 = vector.extract_strided_slice %224 {offsets = [0, 64], sizes = [8, 32], strides = [1, 1]} : vector<8x128xf32> to vector<8x32xf32>
    %228 = vector.extract_strided_slice %223 {offsets = [0, 96], sizes = [8, 32], strides = [1, 1]} : vector<8x128xf32> to vector<8x32xf32>
    %229 = arith.mulf %226, %191 : vector<8x32xf32>
    %230 = arith.mulf %225, %227 : vector<8x32xf32>
    %231 = arith.addf %229, %230 : vector<8x32xf32>
    %232 = math.tanh %231 : vector<8x32xf32>
    %233 = arith.mulf %228, %232 : vector<8x32xf32>
    %234 = arith.truncf %233 : vector<8x32xf32> to vector<8x32xbf16>
    %cst_42 = arith.constant dense<0.000000e+00> : vector<8x128xf32>
    %235 = tpu.matmul %234, %7, %cst_42 {dimension_numbers = #tpu.dot_dimension_numbers<[1], [0], [0], [1], [0, 0, 1, 1], [], []>} : vector<8x32xbf16>, vector<32x128xbf16>, vector<8x128xf32> -> vector<8x128xf32>
    %236 = arith.addf %235, %214 : vector<8x128xf32>
    %237 = arith.addf %236, %11 : vector<8x128xf32>
    %238 = arith.negf %237 : vector<8x128xf32>
    %239 = math.exp %238 : vector<8x128xf32>
    %cst_43 = arith.constant 1.000000e+00 : f32
    %240 = vector.broadcast %cst_43 : f32 to vector<8x128xf32>
    %241 = arith.addf %240, %239 : vector<8x128xf32>
    %242 = arith.divf %240, %241 : vector<8x128xf32>
    %243 = math.tanh %237 : vector<8x128xf32>
    %244 = vector.extract_strided_slice %242 {offsets = [0, 0], sizes = [8, 32], strides = [1, 1]} : vector<8x128xf32> to vector<8x32xf32>
    %245 = vector.extract_strided_slice %242 {offsets = [0, 32], sizes = [8, 32], strides = [1, 1]} : vector<8x128xf32> to vector<8x32xf32>
    %246 = vector.extract_strided_slice %243 {offsets = [0, 64], sizes = [8, 32], strides = [1, 1]} : vector<8x128xf32> to vector<8x32xf32>
    %247 = vector.extract_strided_slice %242 {offsets = [0, 96], sizes = [8, 32], strides = [1, 1]} : vector<8x128xf32> to vector<8x32xf32>
    %248 = arith.mulf %245, %210 : vector<8x32xf32>
    %249 = arith.mulf %244, %246 : vector<8x32xf32>
    %250 = arith.addf %248, %249 : vector<8x32xf32>
    %251 = math.tanh %250 : vector<8x32xf32>
    %252 = arith.mulf %247, %251 : vector<8x32xf32>
    %253 = arith.truncf %252 : vector<8x32xf32> to vector<8x32xbf16>
    %cst_44 = arith.constant dense<0.000000e+00> : vector<8x128xf32>
    %254 = tpu.matmul %253, %8, %cst_44 {dimension_numbers = #tpu.dot_dimension_numbers<[1], [0], [0], [1], [0, 0, 1, 1], [], []>} : vector<8x32xbf16>, vector<32x128xbf16>, vector<8x128xf32> -> vector<8x128xf32>
    %255 = vector.extract_strided_slice %5 {offsets = [48, 0], sizes = [8, 128], strides = [1, 1]} : vector<64x128xf32> to vector<8x128xf32>
    %256 = arith.truncf %233 : vector<8x32xf32> to vector<8x32xbf16>
    %cst_45 = arith.constant dense<0.000000e+00> : vector<8x128xf32>
    %257 = tpu.matmul %256, %6, %cst_45 {dimension_numbers = #tpu.dot_dimension_numbers<[1], [0], [0], [1], [0, 0, 1, 1], [], []>} : vector<8x32xbf16>, vector<32x128xbf16>, vector<8x128xf32> -> vector<8x128xf32>
    %258 = arith.addf %255, %257 : vector<8x128xf32>
    %259 = arith.negf %258 : vector<8x128xf32>
    %260 = math.exp %259 : vector<8x128xf32>
    %cst_46 = arith.constant 1.000000e+00 : f32
    %261 = vector.broadcast %cst_46 : f32 to vector<8x128xf32>
    %262 = arith.addf %261, %260 : vector<8x128xf32>
    %263 = arith.divf %261, %262 : vector<8x128xf32>
    %264 = math.tanh %258 : vector<8x128xf32>
    %265 = vector.extract_strided_slice %263 {offsets = [0, 0], sizes = [8, 32], strides = [1, 1]} : vector<8x128xf32> to vector<8x32xf32>
    %266 = vector.extract_strided_slice %263 {offsets = [0, 32], sizes = [8, 32], strides = [1, 1]} : vector<8x128xf32> to vector<8x32xf32>
    %267 = vector.extract_strided_slice %264 {offsets = [0, 64], sizes = [8, 32], strides = [1, 1]} : vector<8x128xf32> to vector<8x32xf32>
    %268 = vector.extract_strided_slice %263 {offsets = [0, 96], sizes = [8, 32], strides = [1, 1]} : vector<8x128xf32> to vector<8x32xf32>
    %269 = arith.mulf %266, %231 : vector<8x32xf32>
    %270 = arith.mulf %265, %267 : vector<8x32xf32>
    %271 = arith.addf %269, %270 : vector<8x32xf32>
    %272 = math.tanh %271 : vector<8x32xf32>
    %273 = arith.mulf %268, %272 : vector<8x32xf32>
    %274 = arith.truncf %273 : vector<8x32xf32> to vector<8x32xbf16>
    %cst_47 = arith.constant dense<0.000000e+00> : vector<8x128xf32>
    %275 = tpu.matmul %274, %7, %cst_47 {dimension_numbers = #tpu.dot_dimension_numbers<[1], [0], [0], [1], [0, 0, 1, 1], [], []>} : vector<8x32xbf16>, vector<32x128xbf16>, vector<8x128xf32> -> vector<8x128xf32>
    %276 = arith.addf %275, %254 : vector<8x128xf32>
    %277 = arith.addf %276, %11 : vector<8x128xf32>
    %278 = arith.negf %277 : vector<8x128xf32>
    %279 = math.exp %278 : vector<8x128xf32>
    %cst_48 = arith.constant 1.000000e+00 : f32
    %280 = vector.broadcast %cst_48 : f32 to vector<8x128xf32>
    %281 = arith.addf %280, %279 : vector<8x128xf32>
    %282 = arith.divf %280, %281 : vector<8x128xf32>
    %283 = math.tanh %277 : vector<8x128xf32>
    %284 = vector.extract_strided_slice %282 {offsets = [0, 0], sizes = [8, 32], strides = [1, 1]} : vector<8x128xf32> to vector<8x32xf32>
    %285 = vector.extract_strided_slice %282 {offsets = [0, 32], sizes = [8, 32], strides = [1, 1]} : vector<8x128xf32> to vector<8x32xf32>
    %286 = vector.extract_strided_slice %283 {offsets = [0, 64], sizes = [8, 32], strides = [1, 1]} : vector<8x128xf32> to vector<8x32xf32>
    %287 = vector.extract_strided_slice %282 {offsets = [0, 96], sizes = [8, 32], strides = [1, 1]} : vector<8x128xf32> to vector<8x32xf32>
    %288 = arith.mulf %285, %250 : vector<8x32xf32>
    %289 = arith.mulf %284, %286 : vector<8x32xf32>
    %290 = arith.addf %288, %289 : vector<8x32xf32>
    %291 = math.tanh %290 : vector<8x32xf32>
    %292 = arith.mulf %287, %291 : vector<8x32xf32>
    %293 = arith.truncf %292 : vector<8x32xf32> to vector<8x32xbf16>
    %cst_49 = arith.constant dense<0.000000e+00> : vector<8x128xf32>
    %294 = tpu.matmul %293, %8, %cst_49 {dimension_numbers = #tpu.dot_dimension_numbers<[1], [0], [0], [1], [0, 0, 1, 1], [], []>} : vector<8x32xbf16>, vector<32x128xbf16>, vector<8x128xf32> -> vector<8x128xf32>
    %295 = vector.extract_strided_slice %5 {offsets = [56, 0], sizes = [8, 128], strides = [1, 1]} : vector<64x128xf32> to vector<8x128xf32>
    %296 = arith.truncf %273 : vector<8x32xf32> to vector<8x32xbf16>
    %cst_50 = arith.constant dense<0.000000e+00> : vector<8x128xf32>
    %297 = tpu.matmul %296, %6, %cst_50 {dimension_numbers = #tpu.dot_dimension_numbers<[1], [0], [0], [1], [0, 0, 1, 1], [], []>} : vector<8x32xbf16>, vector<32x128xbf16>, vector<8x128xf32> -> vector<8x128xf32>
    %298 = arith.addf %295, %297 : vector<8x128xf32>
    %299 = arith.negf %298 : vector<8x128xf32>
    %300 = math.exp %299 : vector<8x128xf32>
    %cst_51 = arith.constant 1.000000e+00 : f32
    %301 = vector.broadcast %cst_51 : f32 to vector<8x128xf32>
    %302 = arith.addf %301, %300 : vector<8x128xf32>
    %303 = arith.divf %301, %302 : vector<8x128xf32>
    %304 = math.tanh %298 : vector<8x128xf32>
    %305 = vector.extract_strided_slice %303 {offsets = [0, 0], sizes = [8, 32], strides = [1, 1]} : vector<8x128xf32> to vector<8x32xf32>
    %306 = vector.extract_strided_slice %303 {offsets = [0, 32], sizes = [8, 32], strides = [1, 1]} : vector<8x128xf32> to vector<8x32xf32>
    %307 = vector.extract_strided_slice %304 {offsets = [0, 64], sizes = [8, 32], strides = [1, 1]} : vector<8x128xf32> to vector<8x32xf32>
    %308 = vector.extract_strided_slice %303 {offsets = [0, 96], sizes = [8, 32], strides = [1, 1]} : vector<8x128xf32> to vector<8x32xf32>
    %309 = arith.mulf %306, %271 : vector<8x32xf32>
    %310 = arith.mulf %305, %307 : vector<8x32xf32>
    %311 = arith.addf %309, %310 : vector<8x32xf32>
    %312 = math.tanh %311 : vector<8x32xf32>
    %313 = arith.mulf %308, %312 : vector<8x32xf32>
    %314 = arith.truncf %313 : vector<8x32xf32> to vector<8x32xbf16>
    %cst_52 = arith.constant dense<0.000000e+00> : vector<8x128xf32>
    %315 = tpu.matmul %314, %7, %cst_52 {dimension_numbers = #tpu.dot_dimension_numbers<[1], [0], [0], [1], [0, 0, 1, 1], [], []>} : vector<8x32xbf16>, vector<32x128xbf16>, vector<8x128xf32> -> vector<8x128xf32>
    %316 = arith.addf %315, %294 : vector<8x128xf32>
    %317 = arith.addf %316, %11 : vector<8x128xf32>
    %318 = arith.negf %317 : vector<8x128xf32>
    %319 = math.exp %318 : vector<8x128xf32>
    %cst_53 = arith.constant 1.000000e+00 : f32
    %320 = vector.broadcast %cst_53 : f32 to vector<8x128xf32>
    %321 = arith.addf %320, %319 : vector<8x128xf32>
    %322 = arith.divf %320, %321 : vector<8x128xf32>
    %323 = math.tanh %317 : vector<8x128xf32>
    %324 = vector.extract_strided_slice %322 {offsets = [0, 0], sizes = [8, 32], strides = [1, 1]} : vector<8x128xf32> to vector<8x32xf32>
    %325 = vector.extract_strided_slice %322 {offsets = [0, 32], sizes = [8, 32], strides = [1, 1]} : vector<8x128xf32> to vector<8x32xf32>
    %326 = vector.extract_strided_slice %323 {offsets = [0, 64], sizes = [8, 32], strides = [1, 1]} : vector<8x128xf32> to vector<8x32xf32>
    %327 = vector.extract_strided_slice %322 {offsets = [0, 96], sizes = [8, 32], strides = [1, 1]} : vector<8x128xf32> to vector<8x32xf32>
    %328 = arith.mulf %325, %290 : vector<8x32xf32>
    %329 = arith.mulf %324, %326 : vector<8x32xf32>
    %330 = arith.addf %328, %329 : vector<8x32xf32>
    %331 = math.tanh %330 : vector<8x32xf32>
    %332 = arith.mulf %327, %331 : vector<8x32xf32>
    %333 = tpu.concatenate %52, %92, %132, %172, %212, %252, %292, %332 in 0 : vector<8x32xf32>, vector<8x32xf32>, vector<8x32xf32>, vector<8x32xf32>, vector<8x32xf32>, vector<8x32xf32>, vector<8x32xf32>, vector<8x32xf32> -> vector<64x32xf32>
    %334 = arith.truncf %333 : vector<64x32xf32> to vector<64x32xbf16>
    %c0_54 = arith.constant 0 : index
    %c0_55 = arith.constant 0 : index
    %335 = vector.load %arg7[%c0_54, %c0_55] : memref<32x1xbf16, #tpu.memory_space<vmem>>, vector<32x1xbf16>
    %cst_56 = arith.constant dense<0.000000e+00> : vector<64x1xf32>
    %336 = tpu.matmul %334, %335, %cst_56 {dimension_numbers = #tpu.dot_dimension_numbers<[1], [0], [0], [1], [0, 0, 1, 1], [], []>} : vector<64x32xbf16>, vector<32x1xbf16>, vector<64x1xf32> -> vector<64x1xf32>
    %c0_57 = arith.constant 0 : index
    %c0_58 = arith.constant 0 : index
    %337 = vector.load %arg8[%c0_57, %c0_58] : memref<1x1xf32, #tpu.memory_space<vmem>>, vector<1x1xf32>
    %338 = vector.broadcast %337 : vector<1x1xf32> to vector<64x1xf32>
    %339 = arith.addf %336, %338 : vector<64x1xf32>
    %c0_59 = arith.constant 0 : index
    %c0_60 = arith.constant 0 : index
    %340 = vector.load %arg9[%c0_59, %c0_60] : memref<64x1xf32, #tpu.memory_space<vmem>>, vector<64x1xf32>
    tpu.vector_store %arg9[%c0_59, %c0_60], %339 {strides = array<i32>} : memref<64x1xf32, #tpu.memory_space<vmem>>, vector<64x1xf32>,
    return
  }
}

</mosaic_0001>

<bundles_post_ra>
// kernel: tpu_custom_call.1
= control target key start
LH: loop header
LB: loop body
LE: loop exit
PB: predicated region body
PF: predicated region fallthrough
CT: control target
= control target key end

     0   :  { %vm84_vm0 = vcmask 1041408   ;;  %vm71_vm1 = vcmask 31744   ;;  %v2318_v4 = vmov 0.0   ;;  %vm2319_vm2 = vmmov 0   ;;  %s2322_s26 = smov 32   ;;  %s2834_s1 = inlined_call_operand.vmem [shape: bf16[4,128], index: 1, kind: input, shape index: {}]   ;;  %s2835_s0 = inlined_call_operand.vmem [shape: bf16[64,4], index: 0, kind: input, shape index: {}]   ;;  %s2836_s5 = inlined_call_operand.vmem [shape: bf16[32,128], index: 5, kind: input, shape index: {}]   ;;  %s2837_s2 = inlined_call_operand.vmem [shape: bf16[32,128], index: 2, kind: input, shape index: {}]   ;;  %s2838_s3 = inlined_call_operand.vmem [shape: f32[1,128], index: 3, kind: input, shape index: {}]   ;;  %s2839_s4 = inlined_call_operand.vmem [shape: bf16[32,128], index: 4, kind: input, shape index: {}]   ;;  %s2840_s6 = inlined_call_operand.vmem [shape: f32[1,128], index: 6, kind: input, shape index: {}]   ;;  %s2841_s7 = inlined_call_operand.vmem [shape: bf16[32,1], index: 7, kind: input, shape index: {}]   ;;  %s2842_s8 = inlined_call_operand.<no memory space> [shape: f32[1,1], index: 8, kind: input, shape index: {}]   ;;  %s2843_s9 = inlined_call_operand.vmem [shape: f32[64,1], index: 9, kind: output, shape index: {}]  }
   0x1   :  { %v43_v0 = vld [vmem:[%s2834_s1] sm:$0x3]  ;;  %v2173_v2 = vld [vmem:[%s2835_s0 + $0x10] sm:$0xff]   ;;  %v2174_v3 = vld [vmem:[%s2835_s0 + $0x18] sm:$0xff]   ;;  %v2320_v10 = vmov 0   ;;  %vm184_vm3 = vcmask 261120  }
   0x2   :  { %2167 = vmatprep.subr.msk.bf16.mxu1 %vm84_vm0, %v43_v0  ;;  %v86_v1 = vsel %vm84_vm0, %v43_v0, 0  ;;  %2166 = vmatprep.subr.msk.bf16.mxu0 %vm84_vm0, %v43_v0  ;;  %v2387_v5 = vld [vmem:[%s2836_s5] sm:$0xff]   ;;  %v2394_v6 = vld [vmem:[%s2836_s5 + $0x8] sm:$0xff]   ;;  %vm1793_vm4 = vcmask 7168  }
   0x3   :  { %2165 = vmatpush3.bf16.msra.mxu1 %v86_v1  ;;  %1951 = vmatpush3.bf16.msra.mxu0 %v86_v1  ;;  %v2178_v7 = vld [vmem:[%s2835_s0] sm:$0xff]   ;;  %v2179_v8 = vld [vmem:[%s2835_s0 + $0x8] sm:$0xff]  }
   0x4   :  { %1956 = vmatprep.mubr.msk.bf16.mxu1 %vm71_vm1, %v2173_v2  ;;  %1960 = vmatprep.subr.bf16.mxu1 %v2318_v4  ;;  %v2412_v9 = vld [vmem:[%s2837_s2] sm:$0xff]   ;;  %v2421_v11 = vld [vmem:[%s2837_s2 + $0x8] sm:$0xff]  }
   0x5   :  { %1976 = vmatprep.subr.bf16.mxu0 %v2318_v4  ;;  %1952 = vmatprep.mubr.msk.bf16.mxu0 %vm71_vm1, %v2178_v7  ;;  %v1806_v12 = vld [vmem:[%s2838_s3] ss:$0 sm:$0xff]  ;;  %s2321_s3 = smov 64   ;;  %v2465_v49 = vld [vmem:[%s2839_s4 + $0x8] sm:$0xff]  }
   0x6   :  { %1957 = vmatmul.mubr.msk.bf16.vlgmr.msra.gmra.mrb[0].mxu1 %vm71_vm1, %v2174_v3  ;;  %1953 = vmatmul.mubr.msk.bf16.vlgmr.msra.gmra.mrb[0].mxu0 %vm71_vm1, %v2179_v8  ;;  %v2459_v48 = vld [vmem:[%s2839_s4] sm:$0xff]  }
   0x7   :  { %1961 = vmatpush3.bf16.msra.mxu1 %v2387_v5  ;;  %1964 = vmatprep.mubr.msk.bf16.mxu1 %vm2319_vm2, %v2318_v4  ;;  %v2489_v55 = vld [vmem:[%s2840_s6] ss:$0 sm:$0xff] }
   0x8   :  { %1962 = vmatprep.subr.bf16.mxu1 %v2318_v4  ;;  %1980 = vmatprep.mubr.msk.bf16.mxu0 %vm2319_vm2, %v2318_v4 }
   0x9   :  { %1977 = vmatpush3.bf16.msra.mxu0 %v2459_v48 }
   0xa   :  { %1978 = vmatprep.subr.bf16.mxu0 %v2318_v4 }
   0xb   :  { %1963 = vmatpush3.bf16.msra.mxu1 %v2394_v6 }
   0xc   :  { %1968 = vmatprep.subr.bf16.mxu1 %v2318_v4 }
   0xd   :  { %1979 = vmatpush3.bf16.msra.mxu0 %v2465_v49 }
   0xe   :  { %1965 = vmatmul.mubr.bf16.vlgmr.msra.gmra.mrb[4].mxu1 %v2320_v10  ;;  %1992 = vmatprep.subr.bf16.mxu0 %v2318_v4 }
   0xf   :  { %1969 = vmatpush3.bf16.msra.mxu1 %v2412_v9  ;;  %1972 = vmatprep.mubr.msk.bf16.mxu1 %vm2319_vm2, %v2318_v4 }
  0x10   :  { %1970 = vmatprep.subr.bf16.mxu1 %v2318_v4 }
  0x13   :  { %1971 = vmatpush3.bf16.msra.mxu1 %v2421_v11 }
  0x14   :  { %1984 = vmatprep.subr.bf16.mxu1 %v2318_v4 }
  0x16   :  { %1973 = vmatmul.mubr.bf16.vlgmr.msra.gmra.mrb[8].mxu1 %v2320_v10 }
  0x17   :  { %1985 = vmatpush3.bf16.msra.mxu1 %v2387_v5  ;;  %1988 = vmatprep.mubr.msk.bf16.mxu1 %vm2319_vm2, %v2318_v4 }
  0x18   :  { %1986 = vmatprep.subr.bf16.mxu1 %v2318_v4 }
  0x1b   :  { %1987 = vmatpush3.bf16.msra.mxu1 %v2394_v6 }
  0x1c   :  { %2000 = vmatprep.subr.bf16.mxu1 %v2318_v4 }
  0xd9   :  { %v1958_v13 = vpop.f32.mrb[0].mxu1  ;;  %v1954_v21 = vpop.f32.mrb[0].mxu0 }
  0xda   :  { %v2437_v14 = vadd.f32 %v1958_v13, %v1806_v12  ;;  %v138_v15 = vpop.f32.mrb[1].mxu1  ;;  %v2445_v22 = vadd.f32 %v1954_v21, %v1806_v12  ;;  %v122_v23 = vpop.f32.mrb[1].mxu0 }
  0xdb   :  { %v2439_v16 = vadd.f32 %v1806_v12, %v138_v15  ;;  %v1959_v17 = vpop.f32.mrb[2].mxu1  ;;  %v1955_v24 = vpop.f32.mrb[2].mxu0  ;;  %v123_v32 = vadd.f32 %v1806_v12, %v122_v23 }
  0xdc   :  { %v2441_v18 = vadd.f32 %v1959_v17, %v1806_v12  ;;  %v141_v19 = vpop.f32.mrb[3].mxu1  ;;  %v2447_v25 = vadd.f32 %v1955_v24, %v1806_v12  ;;  %v125_v26 = vpop.f32.mrb[3].mxu0 }
  0xdd   :  { %v2443_v20 = vadd.f32 %v1806_v12, %v141_v19  ;;  %v2449_v28 = vadd.f32 %v1806_v12, %v125_v26 }
  0xe1   :  { %v222_v27 = vpop.f32.mrb[4].mxu1 }
  0xe2   :  { %v1966_v29 = vpop.f32.mrb[5].mxu1 }
  0xe3   :  { %v225_v30 = vpop.f32.mrb[6].mxu1 }
  0xe4   :  { %v1967_v31 = vpop.f32.mrb[7].mxu1 }
  0xe9   :  { %v274_v33 = vpop.f32.mrb[8].mxu1 }
  0xea   :  { %v280_v34 = vadd.f32 %v274_v33, %v123_v32  ;;  %v1974_v35 = vpop.f32.mrb[9].mxu1 }
  0xeb   :  { %v277_v36 = vpop.f32.mrb[10].mxu1 }
  0xec   :  { %2185 = vtanh.f32 %v280_v34  ;;  %v1975_v37 = vpop.f32.mrb[11].mxu1  ;;  %v1820_v39 = vmul.f32 -1.442695, %v280_v34 }
  0xee   :  { %2187 = vpow2.f32 %v1820_v39 }
  0xf6   :  { %v2186_v38 = vpop.eup %2185 }
  0xf7   :  { %290 = vrot.lane.b32.xlu0 %v2186_v38, %s2321_s3 }
  0xf8   :  { %v2188_v40 = vpop.eup %2187 }
  0xf9   :  { %v284_v41 = vadd.f32 1.0, %v2188_v40 }
  0xfb   :  { %2189 = vrcp.f32 %v284_v41 }
 0x105   :  { %v2190_v42 = vpop.eup %2189 }
 0x106   :  { %v288_v45 = vmul.f32 0.0, %v2190_v42 }
 0x169   :  { %v291_v43 = vpop.permute.xlu0 %290 }
 0x16a   :  { %v293_v44 = vmul.f32 %v2190_v42, %v291_v43 }
 0x16c   :  { %295 = vrot.lane.b32.xlu0 %v293_v44, %s2322_s26 }
 0x1de   :  { %v296_v46 = vpop.permute.xlu0 %295 }
 0x1df   :  { %v2453_v47 = vadd.f32 %v296_v46, %v288_v45 }
 0x1e1   :  { %2191 = vtanh.f32 %v2453_v47 }
 0x1eb   :  { %v2192_v50 = vpop.eup %2191 }
 0x1ec   :  { %301 = vrot.lane.b32.xlu1 %v2192_v50, %s2321_s3 }
 0x25e   :  { %v302_v51 = vpop.permute.xlu1 %301 }
 0x25f   :  { %v304_v52 = vmul.f32 %v2190_v42, %v302_v51 }
 0x261   :  { %v305_v53 = vpack.c.bf16 %v304_v52, %v304_v52 }
 0x263   :  { %307 = vrot.lane.b32.xlu1 %v305_v53, %s2322_s26 }
 0x2d5   :  { %v308_v54 = vpop.permute.xlu1 %307 }
 0x2d6   :  { %1981 = vmatmul.mubr.msk.bf16.vlgmr.msra.gmra.mrb[4].mxu0 %vm184_vm3, %v308_v54 }
 0x2d7   :  { %1993 = vmatpush3.bf16.msra.mxu0 %v2412_v9  ;;  %1996 = vmatprep.mubr.msk.bf16.mxu0 %vm2319_vm2, %v2318_v4 }
 0x2d8   :  { %1994 = vmatprep.subr.bf16.mxu0 %v2318_v4 }
 0x2db   :  { %1995 = vmatpush3.bf16.msra.mxu0 %v2421_v11 }
 0x2dc   :  { %2008 = vmatprep.subr.bf16.mxu0 %v2318_v4 }
 0x2de   :  { %1997 = vmatmul.mubr.msk.bf16.vlgmr.msra.gmra.mrb[8].mxu0 %vm184_vm3, %v308_v54 }
 0x2df   :  { %2009 = vmatpush3.bf16.msra.mxu0 %v2387_v5  ;;  %2012 = vmatprep.mubr.msk.bf16.mxu0 %vm2319_vm2, %v2318_v4 }
 0x2e0   :  { %2010 = vmatprep.subr.bf16.mxu0 %v2318_v4 }
 0x2e3   :  { %2011 = vmatpush3.bf16.msra.mxu0 %v2394_v6 }
 0x2e4   :  { %2024 = vmatprep.subr.bf16.mxu0 %v2318_v4 }
 0x3a9   :  { %v358_v56 = vpop.f32.mrb[4].mxu0 }
 0x3aa   :  { %v359_v57 = vadd.f32 %v358_v56, %v222_v27  ;;  %v1982_v58 = vpop.f32.mrb[5].mxu0 }
 0x3ab   :  { %v361_v59 = vpop.f32.mrb[6].mxu0 }
 0x3ac   :  { %v364_v60 = vadd.f32 %v2489_v55, %v359_v57  ;;  %v1983_v61 = vpop.f32.mrb[7].mxu0 }
 0x3ae   :  { %2193 = vtanh.f32 %v364_v60  ;;  %v1824_v8 = vmul.f32 -1.442695, %v364_v60 }
 0x3b1   :  { %v470_v62 = vpop.f32.mrb[8].mxu0 }
 0x3b2   :  { %v476_v63 = vadd.f32 %v470_v62, %v2449_v28  ;;  %v1998_v0 = vpop.f32.mrb[9].mxu0 }
 0x3b3   :  { %v473_v1 = vpop.f32.mrb[10].mxu0 }
 0x3b4   :  { %2195 = vtanh.f32 %v476_v63  ;;  %v1999_v2 = vpop.f32.mrb[11].mxu0  ;;  %v1827_v10 = vmul.f32 -1.442695, %v476_v63 }
 0x3b5   :  { %2197 = vpow2.f32 %v1824_v8 }
 0x3b6   :  { %2199 = vpow2.f32 %v1827_v10 }
 0x3b8   :  { %v2194_v3 = vpop.eup %2193 }
 0x3b9   :  { %374 = vrot.lane.b32.xlu0 %v2194_v3, %s2321_s3 }
 0x3be   :  { %v2196_v7 = vpop.eup %2195 }
 0x3bf   :  { %486 = vrot.lane.b32.xlu1 %v2196_v7, %s2321_s3  ;;  %v2198_v12 = vpop.eup %2197 }
 0x3c0   :  { %v368_v13 = vadd.f32 1.0, %v2198_v12  ;;  %v2200_v15 = vpop.eup %2199 }
 0x3c1   :  { %v480_v17 = vadd.f32 1.0, %v2200_v15 }
 0x3c2   :  { %2201 = vrcp.f32 %v368_v13 }
 0x3c3   :  { %2203 = vrcp.f32 %v480_v17 }
 0x3cc   :  { %v2202_v19 = vpop.eup %2201 }
 0x3cd   :  { %v2204_v24 = vpop.eup %2203  ;;  %v372_v28 = vmul.f32 0.0, %v2202_v19 }
 0x3ce   :  { %v484_v31 = vmul.f32 %v2204_v24, %v2453_v47 }
 0x42b   :  { %v375_v21 = vpop.permute.xlu0 %374 }
 0x42c   :  { %v377_v23 = vmul.f32 %v2202_v19, %v375_v21 }
 0x42e   :  { %379 = vrot.lane.b32.xlu0 %v377_v23, %s2322_s26 }
 0x431   :  { %v487_v26 = vpop.permute.xlu1 %486 }
 0x432   :  { %v489_v27 = vmul.f32 %v2204_v24, %v487_v26 }
 0x434   :  { %491 = vrot.lane.b32.xlu1 %v489_v27, %s2322_s26 }
 0x4a0   :  { %v380_v29 = vpop.permute.xlu0 %379 }
 0x4a1   :  { %v2497_v30 = vadd.f32 %v380_v29, %v372_v28 }
 0x4a3   :  { %2205 = vtanh.f32 %v2497_v30 }
 0x4a6   :  { %v492_v32 = vpop.permute.xlu1 %491 }
 0x4a7   :  { %v2501_v33 = vadd.f32 %v492_v32, %v484_v31 }
 0x4a9   :  { %2207 = vtanh.f32 %v2501_v33 }
 0x4ad   :  { %v2206_v34 = vpop.eup %2205 }
 0x4ae   :  { %385 = vrot.lane.b32.xlu0 %v2206_v34, %s2321_s3 }
 0x4b3   :  { %v2208_v35 = vpop.eup %2207 }
 0x4b4   :  { %497 = vrot.lane.b32.xlu1 %v2208_v35, %s2321_s3 }
 0x520   :  { %v386_v36 = vpop.permute.xlu0 %385 }
 0x521   :  { %v2506_v37 = vmul.f32 %v2202_v19, %v386_v36 }
 0x523   :  { %v389_v38 = vpack.c.bf16 %v2506_v37, %v2506_v37 }
 0x525   :  { %391 = vrot.lane.b32.xlu0 %v389_v38, %s2322_s26 }
 0x526   :  { %v498_v39 = vpop.permute.xlu1 %497 }
 0x527   :  { %v500_v40 = vmul.f32 %v2204_v24, %v498_v39 }
 0x529   :  { %v501_v41 = vpack.c.bf16 %v500_v40, %v500_v40 }
 0x52b   :  { %503 = vrot.lane.b32.xlu1 %v501_v41, %s2322_s26 }
 0x597   :  { %v392_v42 = vpop.permute.xlu0 %391 }
 0x598   :  { %1989 = vmatmul.mubr.msk.bf16.vlgmr.msra.gmra.mrb[12].mxu1 %vm184_vm3, %v392_v42 }
 0x599   :  { %2001 = vmatpush3.bf16.msra.mxu1 %v2459_v48  ;;  %2004 = vmatprep.mubr.msk.bf16.mxu1 %vm2319_vm2, %v2318_v4 }
 0x59a   :  { %2002 = vmatprep.subr.bf16.mxu1 %v2318_v4 }
 0x59d   :  { %2003 = vmatpush3.bf16.msra.mxu1 %v2465_v49  ;;  %v504_v43 = vpop.permute.xlu1 %503 }
 0x59e   :  { %2016 = vmatprep.subr.bf16.mxu1 %v2318_v4 }
 0x5a0   :  { %2005 = vmatmul.mubr.msk.bf16.vlgmr.msra.gmra.mrb[16].mxu1 %vm184_vm3, %v504_v43 }
 0x5a1   :  { %2017 = vmatpush3.bf16.msra.mxu1 %v2412_v9  ;;  %2020 = vmatprep.mubr.msk.bf16.mxu1 %vm2319_vm2, %v2318_v4 }
 0x5a2   :  { %2018 = vmatprep.subr.bf16.mxu1 %v2318_v4 }
 0x5a5   :  { %2019 = vmatpush3.bf16.msra.mxu1 %v2421_v11 }
 0x5a6   :  { %2032 = vmatprep.subr.bf16.mxu1 %v2318_v4 }
 0x5a8   :  { %2021 = vmatmul.mubr.msk.bf16.vlgmr.msra.gmra.mrb[20].mxu1 %vm184_vm3, %v504_v43 }
 0x5a9   :  { %2033 = vmatpush3.bf16.msra.mxu1 %v2387_v5  ;;  %2036 = vmatprep.mubr.msk.bf16.mxu1 %vm2319_vm2, %v2318_v4 }
 0x5aa   :  { %2034 = vmatprep.subr.bf16.mxu1 %v2318_v4 }
 0x5ad   :  { %2035 = vmatpush3.bf16.msra.mxu1 %v2394_v6 }
 0x5ae   :  { %2048 = vmatprep.subr.bf16.mxu1 %v2318_v4 }
 0x66b   :  { %v430_v44 = vpop.f32.mrb[12].mxu1 }
 0x66c   :  { %v1990_v45 = vpop.f32.mrb[13].mxu1 }
 0x66d   :  { %v433_v46 = vpop.f32.mrb[14].mxu1 }
 0x66e   :  { %v1991_v47 = vpop.f32.mrb[15].mxu1 }
 0x673   :  { %v542_v50 = vpop.f32.mrb[16].mxu1 }
 0x674   :  { %v543_v51 = vadd.f32 %v542_v50, %v430_v44  ;;  %v2006_v52 = vpop.f32.mrb[17].mxu1 }
 0x675   :  { %v545_v53 = vpop.f32.mrb[18].mxu1 }
 0x676   :  { %v548_v54 = vadd.f32 %v2489_v55, %v543_v51  ;;  %v2007_v56 = vpop.f32.mrb[19].mxu1 }
 0x678   :  { %2209 = vtanh.f32 %v548_v54  ;;  %v1829_v0 = vmul.f32 -1.442695, %v548_v54 }
 0x67b   :  { %v654_v57 = vpop.f32.mrb[20].mxu1 }
 0x67c   :  { %v660_v58 = vadd.f32 %v654_v57, %v2445_v22  ;;  %v2022_v59 = vpop.f32.mrb[21].mxu1 }
 0x67d   :  { %v657_v60 = vpop.f32.mrb[22].mxu1 }
 0x67e   :  { %2211 = vtanh.f32 %v660_v58  ;;  %v2023_v61 = vpop.f32.mrb[23].mxu1  ;;  %v1832_v1 = vmul.f32 -1.442695, %v660_v58 }
 0x67f   :  { %2213 = vpow2.f32 %v1829_v0 }
 0x680   :  { %2215 = vpow2.f32 %v1832_v1 }
 0x682   :  { %v2210_v62 = vpop.eup %2209 }
 0x683   :  { %558 = vrot.lane.b32.xlu0 %v2210_v62, %s2321_s3 }
 0x688   :  { %v2212_v63 = vpop.eup %2211 }
 0x689   :  { %670 = vrot.lane.b32.xlu1 %v2212_v63, %s2321_s3  ;;  %v2214_v2 = vpop.eup %2213 }
 0x68a   :  { %v552_v3 = vadd.f32 1.0, %v2214_v2  ;;  %v2216_v7 = vpop.eup %2215 }
 0x68b   :  { %v664_v8 = vadd.f32 1.0, %v2216_v7 }
 0x68c   :  { %2217 = vrcp.f32 %v552_v3 }
 0x68d   :  { %2219 = vrcp.f32 %v664_v8 }
 0x696   :  { %v2218_v22 = vpop.eup %2217 }
 0x697   :  { %v2220_v13 = vpop.eup %2219  ;;  %v556_v19 = vmul.f32 %v2218_v22, %v2497_v30 }
 0x698   :  { %v668_v24 = vmul.f32 %v2220_v13, %v2501_v33 }
 0x6f5   :  { %v559_v10 = vpop.permute.xlu0 %558 }
 0x6f6   :  { %v561_v12 = vmul.f32 %v2218_v22, %v559_v10 }
 0x6f8   :  { %563 = vrot.lane.b32.xlu0 %v561_v12, %s2322_s26 }
 0x6fb   :  { %v671_v15 = vpop.permute.xlu1 %670 }
 0x6fc   :  { %v673_v17 = vmul.f32 %v2220_v13, %v671_v15 }
 0x6fe   :  { %675 = vrot.lane.b32.xlu1 %v673_v17, %s2322_s26 }
 0x76a   :  { %v564_v21 = vpop.permute.xlu0 %563 }
 0x76b   :  { %v2540_v23 = vadd.f32 %v564_v21, %v556_v19 }
 0x76d   :  { %2221 = vtanh.f32 %v2540_v23 }
 0x770   :  { %v676_v26 = vpop.permute.xlu1 %675 }
 0x771   :  { %v2544_v27 = vadd.f32 %v676_v26, %v668_v24 }
 0x773   :  { %2223 = vtanh.f32 %v2544_v27 }
 0x777   :  { %v2222_v28 = vpop.eup %2221 }
 0x778   :  { %569 = vrot.lane.b32.xlu0 %v2222_v28, %s2321_s3 }
 0x77d   :  { %v2224_v29 = vpop.eup %2223 }
 0x77e   :  { %681 = vrot.lane.b32.xlu1 %v2224_v29, %s2321_s3 }
 0x7ea   :  { %v570_v31 = vpop.permute.xlu0 %569 }
 0x7eb   :  { %v2549_v30 = vmul.f32 %v2218_v22, %v570_v31 }
 0x7ed   :  { %v573_v32 = vpack.c.bf16 %v2549_v30, %v2549_v30 }
 0x7ef   :  { %575 = vrot.lane.b32.xlu0 %v573_v32, %s2322_s26 }
 0x7f0   :  { %v682_v33 = vpop.permute.xlu1 %681 }
 0x7f1   :  { %v684_v34 = vmul.f32 %v2220_v13, %v682_v33 }
 0x7f3   :  { %v685_v35 = vpack.c.bf16 %v684_v34, %v684_v34 }
 0x7f5   :  { %687 = vrot.lane.b32.xlu1 %v685_v35, %s2322_s26 }
 0x861   :  { %v576_v36 = vpop.permute.xlu0 %575 }
 0x862   :  { %2013 = vmatmul.mubr.msk.bf16.vlgmr.msra.gmra.mrb[12].mxu0 %vm184_vm3, %v576_v36 }
 0x863   :  { %2025 = vmatpush3.bf16.msra.mxu0 %v2459_v48  ;;  %2028 = vmatprep.mubr.msk.bf16.mxu0 %vm2319_vm2, %v2318_v4 }
 0x864   :  { %2026 = vmatprep.subr.bf16.mxu0 %v2318_v4 }
 0x867   :  { %2027 = vmatpush3.bf16.msra.mxu0 %v2465_v49  ;;  %v688_v38 = vpop.permute.xlu1 %687 }
 0x868   :  { %2040 = vmatprep.subr.bf16.mxu0 %v2318_v4 }
 0x86a   :  { %2029 = vmatmul.mubr.msk.bf16.vlgmr.msra.gmra.mrb[16].mxu0 %vm184_vm3, %v688_v38 }
 0x86b   :  { %2041 = vmatpush3.bf16.msra.mxu0 %v2412_v9  ;;  %2044 = vmatprep.mubr.msk.bf16.mxu0 %vm2319_vm2, %v2318_v4 }
 0x86c   :  { %2042 = vmatprep.subr.bf16.mxu0 %v2318_v4 }
 0x86f   :  { %2043 = vmatpush3.bf16.msra.mxu0 %v2421_v11 }
 0x870   :  { %2056 = vmatprep.subr.bf16.mxu0 %v2318_v4 }
 0x872   :  { %2045 = vmatmul.mubr.msk.bf16.vlgmr.msra.gmra.mrb[20].mxu0 %vm184_vm3, %v688_v38 }
 0x873   :  { %2057 = vmatpush3.bf16.msra.mxu0 %v2387_v5  ;;  %2060 = vmatprep.mubr.msk.bf16.mxu0 %vm2319_vm2, %v2318_v4 }
 0x874   :  { %2058 = vmatprep.subr.bf16.mxu0 %v2318_v4 }
 0x877   :  { %2059 = vmatpush3.bf16.msra.mxu0 %v2394_v6 }
 0x878   :  { %2072 = vmatprep.subr.bf16.mxu0 %v2318_v4 }
 0x935   :  { %v614_v39 = vpop.f32.mrb[12].mxu0 }
 0x936   :  { %v2014_v40 = vpop.f32.mrb[13].mxu0 }
 0x937   :  { %v617_v41 = vpop.f32.mrb[14].mxu0 }
 0x938   :  { %v2015_v42 = vpop.f32.mrb[15].mxu0 }
 0x93d   :  { %v726_v43 = vpop.f32.mrb[16].mxu0 }
 0x93e   :  { %v727_v44 = vadd.f32 %v726_v43, %v614_v39  ;;  %v2030_v45 = vpop.f32.mrb[17].mxu0 }
 0x93f   :  { %v729_v46 = vpop.f32.mrb[18].mxu0 }
 0x940   :  { %v732_v47 = vadd.f32 %v2489_v55, %v727_v44  ;;  %v2031_v50 = vpop.f32.mrb[19].mxu0 }
 0x942   :  { %2225 = vtanh.f32 %v732_v47  ;;  %v1834_v59 = vmul.f32 -1.442695, %v732_v47 }
 0x945   :  { %v838_v51 = vpop.f32.mrb[20].mxu0 }
 0x946   :  { %v844_v52 = vadd.f32 %v838_v51, %v2447_v25  ;;  %v2046_v53 = vpop.f32.mrb[21].mxu0 }
 0x947   :  { %v841_v54 = vpop.f32.mrb[22].mxu0 }
 0x948   :  { %2227 = vtanh.f32 %v844_v52  ;;  %v2047_v56 = vpop.f32.mrb[23].mxu0  ;;  %v1837_v60 = vmul.f32 -1.442695, %v844_v52 }
 0x949   :  { %2229 = vpow2.f32 %v1834_v59 }
 0x94a   :  { %2231 = vpow2.f32 %v1837_v60 }
 0x94c   :  { %v2226_v57 = vpop.eup %2225 }
 0x94d   :  { %742 = vrot.lane.b32.xlu0 %v2226_v57, %s2321_s3 }
 0x952   :  { %v2228_v58 = vpop.eup %2227 }
 0x953   :  { %854 = vrot.lane.b32.xlu1 %v2228_v58, %s2321_s3  ;;  %v2230_v61 = vpop.eup %2229 }
 0x954   :  { %v736_v62 = vadd.f32 1.0, %v2230_v61  ;;  %v2232_v63 = vpop.eup %2231 }
 0x955   :  { %v848_v0 = vadd.f32 1.0, %v2232_v63 }
 0x956   :  { %2233 = vrcp.f32 %v736_v62 }
 0x957   :  { %2235 = vrcp.f32 %v848_v0 }
 0x960   :  { %v2234_v25 = vpop.eup %2233 }
 0x961   :  { %v2236_v3 = vpop.eup %2235  ;;  %v740_v22 = vmul.f32 %v2234_v25, %v2540_v23 }
 0x962   :  { %v852_v13 = vmul.f32 %v2236_v3, %v2544_v27 }
 0x9bf   :  { %v743_v1 = vpop.permute.xlu0 %742 }
 0x9c0   :  { %v745_v2 = vmul.f32 %v2234_v25, %v743_v1 }
 0x9c2   :  { %747 = vrot.lane.b32.xlu0 %v745_v2, %s2322_s26 }
 0x9c5   :  { %v855_v7 = vpop.permute.xlu1 %854 }
 0x9c6   :  { %v857_v8 = vmul.f32 %v2236_v3, %v855_v7 }
 0x9c8   :  { %859 = vrot.lane.b32.xlu1 %v857_v8, %s2322_s26 }
 0xa34   :  { %v748_v10 = vpop.permute.xlu0 %747 }
 0xa35   :  { %v2583_v12 = vadd.f32 %v748_v10, %v740_v22 }
 0xa37   :  { %2237 = vtanh.f32 %v2583_v12 }
 0xa3a   :  { %v860_v15 = vpop.permute.xlu1 %859 }
 0xa3b   :  { %v2587_v17 = vadd.f32 %v860_v15, %v852_v13 }
 0xa3d   :  { %2239 = vtanh.f32 %v2587_v17 }
 0xa41   :  { %v2238_v19 = vpop.eup %2237 }
 0xa42   :  { %753 = vrot.lane.b32.xlu0 %v2238_v19, %s2321_s3 }
 0xa47   :  { %v2240_v21 = vpop.eup %2239 }
 0xa48   :  { %865 = vrot.lane.b32.xlu1 %v2240_v21, %s2321_s3 }
 0xab4   :  { %v754_v24 = vpop.permute.xlu0 %753 }
 0xab5   :  { %v2592_v23 = vmul.f32 %v2234_v25, %v754_v24 }
 0xab7   :  { %v757_v26 = vpack.c.bf16 %v2592_v23, %v2592_v23 }
 0xab9   :  { %759 = vrot.lane.b32.xlu0 %v757_v26, %s2322_s26 }
 0xaba   :  { %v866_v27 = vpop.permute.xlu1 %865 }
 0xabb   :  { %v868_v28 = vmul.f32 %v2236_v3, %v866_v27 }
 0xabd   :  { %v869_v29 = vpack.c.bf16 %v868_v28, %v868_v28 }
 0xabf   :  { %871 = vrot.lane.b32.xlu1 %v869_v29, %s2322_s26 }
 0xb2b   :  { %v760_v31 = vpop.permute.xlu0 %759 }
 0xb2c   :  { %2037 = vmatmul.mubr.msk.bf16.vlgmr.msra.gmra.mrb[24].mxu1 %vm184_vm3, %v760_v31 }
 0xb2d   :  { %2049 = vmatpush3.bf16.msra.mxu1 %v2459_v48  ;;  %2052 = vmatprep.mubr.msk.bf16.mxu1 %vm2319_vm2, %v2318_v4 }
 0xb2e   :  { %2050 = vmatprep.subr.bf16.mxu1 %v2318_v4 }
 0xb31   :  { %2051 = vmatpush3.bf16.msra.mxu1 %v2465_v49  ;;  %v872_v32 = vpop.permute.xlu1 %871 }
 0xb32   :  { %2064 = vmatprep.subr.bf16.mxu1 %v2318_v4 }
 0xb34   :  { %2053 = vmatmul.mubr.msk.bf16.vlgmr.msra.gmra.mrb[28].mxu1 %vm184_vm3, %v872_v32 }
 0xb35   :  { %2065 = vmatpush3.bf16.msra.mxu1 %v2412_v9  ;;  %2068 = vmatprep.mubr.msk.bf16.mxu1 %vm2319_vm2, %v2318_v4 }
 0xb36   :  { %2066 = vmatprep.subr.bf16.mxu1 %v2318_v4 }
 0xb39   :  { %2067 = vmatpush3.bf16.msra.mxu1 %v2421_v11 }
 0xb3a   :  { %2080 = vmatprep.subr.bf16.mxu1 %v2318_v4 }
 0xb3c   :  { %2069 = vmatmul.mubr.msk.bf16.vlgmr.msra.gmra.mrb[32].mxu1 %vm184_vm3, %v872_v32 }
 0xb3d   :  { %2081 = vmatpush3.bf16.msra.mxu1 %v2387_v5  ;;  %2084 = vmatprep.mubr.msk.bf16.mxu1 %vm2319_vm2, %v2318_v4 }
 0xb3e   :  { %2082 = vmatprep.subr.bf16.mxu1 %v2318_v4 }
 0xb41   :  { %2083 = vmatpush3.bf16.msra.mxu1 %v2394_v6 }
 0xb42   :  { %2096 = vmatprep.subr.bf16.mxu1 %v2318_v4 }
 0xbff   :  { %v798_v33 = vpop.f32.mrb[24].mxu1 }
 0xc00   :  { %v2038_v34 = vpop.f32.mrb[25].mxu1 }
 0xc01   :  { %v801_v35 = vpop.f32.mrb[26].mxu1 }
 0xc02   :  { %v2039_v36 = vpop.f32.mrb[27].mxu1 }
 0xc07   :  { %v910_v38 = vpop.f32.mrb[28].mxu1 }
 0xc08   :  { %v911_v39 = vadd.f32 %v910_v38, %v798_v33  ;;  %v2054_v40 = vpop.f32.mrb[29].mxu1 }
 0xc09   :  { %v913_v41 = vpop.f32.mrb[30].mxu1 }
 0xc0a   :  { %v916_v42 = vadd.f32 %v2489_v55, %v911_v39  ;;  %v2055_v43 = vpop.f32.mrb[31].mxu1 }
 0xc0c   :  { %2241 = vtanh.f32 %v916_v42  ;;  %v1839_v53 = vmul.f32 -1.442695, %v916_v42 }
 0xc0f   :  { %v1022_v44 = vpop.f32.mrb[32].mxu1 }
 0xc10   :  { %v1028_v45 = vadd.f32 %v1022_v44, %v2439_v16  ;;  %v2070_v46 = vpop.f32.mrb[33].mxu1 }
 0xc11   :  { %v1025_v47 = vpop.f32.mrb[34].mxu1 }
 0xc12   :  { %2243 = vtanh.f32 %v1028_v45  ;;  %v2071_v50 = vpop.f32.mrb[35].mxu1  ;;  %v1842_v54 = vmul.f32 -1.442695, %v1028_v45 }
 0xc13   :  { %2245 = vpow2.f32 %v1839_v53 }
 0xc14   :  { %2247 = vpow2.f32 %v1842_v54 }
 0xc16   :  { %v2242_v51 = vpop.eup %2241 }
 0xc17   :  { %926 = vrot.lane.b32.xlu0 %v2242_v51, %s2321_s3 }
 0xc1c   :  { %v2244_v52 = vpop.eup %2243 }
 0xc1d   :  { %1038 = vrot.lane.b32.xlu1 %v2244_v52, %s2321_s3  ;;  %v2246_v56 = vpop.eup %2245 }
 0xc1e   :  { %v920_v57 = vadd.f32 1.0, %v2246_v56  ;;  %v2248_v58 = vpop.eup %2247 }
 0xc1f   :  { %v1032_v59 = vadd.f32 1.0, %v2248_v58 }
 0xc20   :  { %2249 = vrcp.f32 %v920_v57 }
 0xc21   :  { %2251 = vrcp.f32 %v1032_v59 }
 0xc2a   :  { %v2250_v16 = vpop.eup %2249 }
 0xc2b   :  { %v2252_v62 = vpop.eup %2251  ;;  %v924_v25 = vmul.f32 %v2250_v16, %v2583_v12 }
 0xc2c   :  { %v1036_v3 = vmul.f32 %v2252_v62, %v2587_v17 }
 0xc89   :  { %v927_v60 = vpop.permute.xlu0 %926 }
 0xc8a   :  { %v929_v61 = vmul.f32 %v2250_v16, %v927_v60 }
 0xc8c   :  { %931 = vrot.lane.b32.xlu0 %v929_v61, %s2322_s26 }
 0xc8f   :  { %v1039_v63 = vpop.permute.xlu1 %1038 }
 0xc90   :  { %v1041_v0 = vmul.f32 %v2252_v62, %v1039_v63 }
 0xc92   :  { %1043 = vrot.lane.b32.xlu1 %v1041_v0, %s2322_s26 }
 0xcfe   :  { %v932_v1 = vpop.permute.xlu0 %931 }
 0xcff   :  { %v2626_v2 = vadd.f32 %v932_v1, %v924_v25 }
 0xd01   :  { %2253 = vtanh.f32 %v2626_v2 }
 0xd04   :  { %v1044_v7 = vpop.permute.xlu1 %1043 }
 0xd05   :  { %v2630_v8 = vadd.f32 %v1044_v7, %v1036_v3 }
 0xd07   :  { %2255 = vtanh.f32 %v2630_v8 }
 0xd0b   :  { %v2254_v22 = vpop.eup %2253 }
 0xd0c   :  { %937 = vrot.lane.b32.xlu0 %v2254_v22, %s2321_s3 }
 0xd11   :  { %v2256_v10 = vpop.eup %2255 }
 0xd12   :  { %1049 = vrot.lane.b32.xlu1 %v2256_v10, %s2321_s3 }
 0xd7e   :  { %v938_v13 = vpop.permute.xlu0 %937 }
 0xd7f   :  { %v2635_v12 = vmul.f32 %v2250_v16, %v938_v13 }
 0xd81   :  { %v941_v15 = vpack.c.bf16 %v2635_v12, %v2635_v12 }
 0xd83   :  { %943 = vrot.lane.b32.xlu0 %v941_v15, %s2322_s26 }
 0xd84   :  { %v1050_v17 = vpop.permute.xlu1 %1049 }
 0xd85   :  { %v1052_v19 = vmul.f32 %v2252_v62, %v1050_v17 }
 0xd87   :  { %v1053_v21 = vpack.c.bf16 %v1052_v19, %v1052_v19 }
 0xd89   :  { %1055 = vrot.lane.b32.xlu1 %v1053_v21, %s2322_s26 }
 0xdf5   :  { %v944_v24 = vpop.permute.xlu0 %943 }
 0xdf6   :  { %2061 = vmatmul.mubr.msk.bf16.vlgmr.msra.gmra.mrb[24].mxu0 %vm184_vm3, %v944_v24 }
 0xdf7   :  { %2073 = vmatpush3.bf16.msra.mxu0 %v2459_v48  ;;  %2076 = vmatprep.mubr.msk.bf16.mxu0 %vm2319_vm2, %v2318_v4 }
 0xdf8   :  { %2074 = vmatprep.subr.bf16.mxu0 %v2318_v4 }
 0xdfb   :  { %2075 = vmatpush3.bf16.msra.mxu0 %v2465_v49  ;;  %v1056_v26 = vpop.permute.xlu1 %1055 }
 0xdfc   :  { %2088 = vmatprep.subr.bf16.mxu0 %v2318_v4 }
 0xdfe   :  { %2077 = vmatmul.mubr.msk.bf16.vlgmr.msra.gmra.mrb[28].mxu0 %vm184_vm3, %v1056_v26 }
 0xdff   :  { %2089 = vmatpush3.bf16.msra.mxu0 %v2412_v9  ;;  %2092 = vmatprep.mubr.msk.bf16.mxu0 %vm2319_vm2, %v2318_v4 }
 0xe00   :  { %2090 = vmatprep.subr.bf16.mxu0 %v2318_v4 }
 0xe03   :  { %2091 = vmatpush3.bf16.msra.mxu0 %v2421_v11 }
 0xe04   :  { %2104 = vmatprep.subr.bf16.mxu0 %v2318_v4 }
 0xe06   :  { %2093 = vmatmul.mubr.msk.bf16.vlgmr.msra.gmra.mrb[32].mxu0 %vm184_vm3, %v1056_v26 }
 0xe07   :  { %2105 = vmatpush3.bf16.msra.mxu0 %v2387_v5  ;;  %2108 = vmatprep.mubr.msk.bf16.mxu0 %vm2319_vm2, %v2318_v4 }
 0xe08   :  { %2106 = vmatprep.subr.bf16.mxu0 %v2318_v4 }
 0xe0b   :  { %2107 = vmatpush3.bf16.msra.mxu0 %v2394_v6 }
 0xe0c   :  { %2120 = vmatprep.subr.bf16.mxu0 %v2318_v4 }
 0xec9   :  { %v982_v27 = vpop.f32.mrb[24].mxu0 }
 0xeca   :  { %v2062_v28 = vpop.f32.mrb[25].mxu0 }
 0xecb   :  { %v985_v29 = vpop.f32.mrb[26].mxu0 }
 0xecc   :  { %v2063_v31 = vpop.f32.mrb[27].mxu0 }
 0xed1   :  { %v1094_v32 = vpop.f32.mrb[28].mxu0 }
 0xed2   :  { %v1095_v33 = vadd.f32 %v1094_v32, %v982_v27  ;;  %v2078_v34 = vpop.f32.mrb[29].mxu0 }
 0xed3   :  { %v1097_v35 = vpop.f32.mrb[30].mxu0 }
 0xed4   :  { %v1100_v36 = vadd.f32 %v2489_v55, %v1095_v33  ;;  %v2079_v38 = vpop.f32.mrb[31].mxu0 }
 0xed6   :  { %2257 = vtanh.f32 %v1100_v36  ;;  %v1844_v46 = vmul.f32 -1.442695, %v1100_v36 }
 0xed9   :  { %v1206_v39 = vpop.f32.mrb[32].mxu0 }
 0xeda   :  { %v1212_v40 = vadd.f32 %v1206_v39, %v2443_v20  ;;  %v2094_v41 = vpop.f32.mrb[33].mxu0 }
 0xedb   :  { %v1209_v42 = vpop.f32.mrb[34].mxu0 }
 0xedc   :  { %2259 = vtanh.f32 %v1212_v40  ;;  %v2095_v43 = vpop.f32.mrb[35].mxu0  ;;  %v1847_v47 = vmul.f32 -1.442695, %v1212_v40 }
 0xedd   :  { %2261 = vpow2.f32 %v1844_v46 }
 0xede   :  { %2263 = vpow2.f32 %v1847_v47 }
 0xee0   :  { %v2258_v44 = vpop.eup %2257 }
 0xee1   :  { %1110 = vrot.lane.b32.xlu0 %v2258_v44, %s2321_s3 }
 0xee6   :  { %v2260_v45 = vpop.eup %2259 }
 0xee7   :  { %1222 = vrot.lane.b32.xlu1 %v2260_v45, %s2321_s3  ;;  %v2262_v50 = vpop.eup %2261 }
 0xee8   :  { %v1104_v51 = vadd.f32 1.0, %v2262_v50  ;;  %v2264_v52 = vpop.eup %2263 }
 0xee9   :  { %v1216_v53 = vadd.f32 1.0, %v2264_v52 }
 0xeea   :  { %2265 = vrcp.f32 %v1104_v51 }
 0xeeb   :  { %2267 = vrcp.f32 %v1216_v53 }
 0xef4   :  { %v2266_v20 = vpop.eup %2265 }
 0xef5   :  { %v2268_v57 = vpop.eup %2267  ;;  %v1108_v16 = vmul.f32 %v2266_v20, %v2626_v2 }
 0xef6   :  { %v1220_v62 = vmul.f32 %v2268_v57, %v2630_v8 }
 0xf53   :  { %v1111_v54 = vpop.permute.xlu0 %1110 }
 0xf54   :  { %v1113_v56 = vmul.f32 %v2266_v20, %v1111_v54 }
 0xf56   :  { %1115 = vrot.lane.b32.xlu0 %v1113_v56, %s2322_s26 }
 0xf59   :  { %v1223_v58 = vpop.permute.xlu1 %1222 }
 0xf5a   :  { %v1225_v59 = vmul.f32 %v2268_v57, %v1223_v58 }
 0xf5c   :  { %1227 = vrot.lane.b32.xlu1 %v1225_v59, %s2322_s26 }
 0xfc8   :  { %v1116_v60 = vpop.permute.xlu0 %1115 }
 0xfc9   :  { %v2669_v61 = vadd.f32 %v1116_v60, %v1108_v16 }
 0xfcb   :  { %2269 = vtanh.f32 %v2669_v61 }
 0xfce   :  { %v1228_v63 = vpop.permute.xlu1 %1227 }
 0xfcf   :  { %v2673_v0 = vadd.f32 %v1228_v63, %v1220_v62 }
 0xfd1   :  { %2271 = vtanh.f32 %v2673_v0 }
 0xfd5   :  { %v2270_v25 = vpop.eup %2269 }
 0xfd6   :  { %1121 = vrot.lane.b32.xlu0 %v2270_v25, %s2321_s3  ;;  %v2313_v25 = vld [vmem:[%s2837_s2] sm:$0xff]  }
 0xfdb   :  { %v2272_v1 = vpop.eup %2271 }
 0xfdc   :  { %1233 = vrot.lane.b32.xlu1 %v2272_v1, %s2321_s3 }
0x1048   :  { %v1122_v3 = vpop.permute.xlu0 %1121 }
0x1049   :  { %v2678_v2 = vmul.f32 %v2266_v20, %v1122_v3 }
0x104b   :  { %v1125_v7 = vpack.c.bf16 %v2678_v2, %v2678_v2 }
0x104d   :  { %1127 = vrot.lane.b32.xlu0 %v1125_v7, %s2322_s26 }
0x104e   :  { %v1234_v8 = vpop.permute.xlu1 %1233 }
0x104f   :  { %v1236_v22 = vmul.f32 %v2268_v57, %v1234_v8 }
0x1051   :  { %v1237_v10 = vpack.c.bf16 %v1236_v22, %v1236_v22 }
0x1053   :  { %1239 = vrot.lane.b32.xlu1 %v1237_v10, %s2322_s26 }
0x10bf   :  { %v1128_v13 = vpop.permute.xlu0 %1127 }
0x10c0   :  { %2085 = vmatmul.mubr.msk.bf16.vlgmr.msra.gmra.mrb[36].mxu1 %vm184_vm3, %v1128_v13 }
0x10c1   :  { %2097 = vmatpush3.bf16.msra.mxu1 %v2459_v48  ;;  %2100 = vmatprep.mubr.msk.bf16.mxu1 %vm2319_vm2, %v2318_v4 }
0x10c2   :  { %2098 = vmatprep.subr.bf16.mxu1 %v2318_v4 }
0x10c5   :  { %2099 = vmatpush3.bf16.msra.mxu1 %v2465_v49  ;;  %v1240_v15 = vpop.permute.xlu1 %1239 }
0x10c6   :  { %2112 = vmatprep.subr.bf16.mxu1 %v2318_v4 }
0x10c8   :  { %2101 = vmatmul.mubr.msk.bf16.vlgmr.msra.gmra.mrb[40].mxu1 %vm184_vm3, %v1240_v15 }
0x10c9   :  { %2113 = vmatpush3.bf16.msra.mxu1 %v2412_v9  ;;  %2116 = vmatprep.mubr.msk.bf16.mxu1 %vm2319_vm2, %v2318_v4 }
0x10ca   :  { %2114 = vmatprep.subr.bf16.mxu1 %v2318_v4 }
0x10cd   :  { %2115 = vmatpush3.bf16.msra.mxu1 %v2421_v11 }
0x10ce   :  { %2128 = vmatprep.subr.bf16.mxu1 %v2318_v4 }
0x10d0   :  { %2117 = vmatmul.mubr.msk.bf16.vlgmr.msra.gmra.mrb[44].mxu1 %vm184_vm3, %v1240_v15 }
0x10d1   :  { %2129 = vmatpush3.bf16.msra.mxu1 %v2387_v5  ;;  %2132 = vmatprep.mubr.msk.bf16.mxu1 %vm2319_vm2, %v2318_v4 }
0x10d2   :  { %2130 = vmatprep.subr.bf16.mxu1 %v2318_v4 }
0x10d5   :  { %2131 = vmatpush3.bf16.msra.mxu1 %v2394_v6 }
0x10d6   :  { %2144 = vmatprep.subr.bf16.mxu1 %v2318_v4 }
0x1193   :  { %v1166_v9 = vpop.f32.mrb[36].mxu1 }
0x1194   :  { %v2086_v17 = vpop.f32.mrb[37].mxu1 }
0x1195   :  { %v1169_v19 = vpop.f32.mrb[38].mxu1 }
0x1196   :  { %v2087_v21 = vpop.f32.mrb[39].mxu1 }
0x119b   :  { %v1278_v11 = vpop.f32.mrb[40].mxu1 }
0x119c   :  { %v1279_v24 = vadd.f32 %v1278_v11, %v1166_v9  ;;  %v2102_v26 = vpop.f32.mrb[41].mxu1 }
0x119d   :  { %v1281_v27 = vpop.f32.mrb[42].mxu1 }
0x119e   :  { %v1284_v28 = vadd.f32 %v2489_v55, %v1279_v24  ;;  %v2103_v5 = vpop.f32.mrb[43].mxu1 }
0x11a0   :  { %2273 = vtanh.f32 %v1284_v28  ;;  %v1849_v36 = vmul.f32 -1.442695, %v1284_v28 }
0x11a3   :  { %v1390_v29 = vpop.f32.mrb[44].mxu1 }
0x11a4   :  { %v1396_v31 = vadd.f32 %v1390_v29, %v2437_v14  ;;  %v2118_v32 = vpop.f32.mrb[45].mxu1 }
0x11a5   :  { %v1393_v33 = vpop.f32.mrb[46].mxu1 }
0x11a6   :  { %2275 = vtanh.f32 %v1396_v31  ;;  %v2119_v6 = vpop.f32.mrb[47].mxu1  ;;  %v1852_v38 = vmul.f32 -1.442695, %v1396_v31 }
0x11a7   :  { %2277 = vpow2.f32 %v1849_v36 }
0x11a8   :  { %2279 = vpow2.f32 %v1852_v38 }
0x11aa   :  { %v2274_v34 = vpop.eup %2273 }
0x11ab   :  { %1294 = vrot.lane.b32.xlu0 %v2274_v34, %s2321_s3 }
0x11b0   :  { %v2276_v35 = vpop.eup %2275 }
0x11b1   :  { %1406 = vrot.lane.b32.xlu1 %v2276_v35, %s2321_s3  ;;  %v2278_v39 = vpop.eup %2277 }
0x11b2   :  { %v1288_v40 = vadd.f32 1.0, %v2278_v39  ;;  %v2280_v41 = vpop.eup %2279 }
0x11b3   :  { %v1400_v42 = vadd.f32 1.0, %v2280_v41 }
0x11b4   :  { %2281 = vrcp.f32 %v1288_v40 }
0x11b5   :  { %2283 = vrcp.f32 %v1400_v42 }
0x11be   :  { %v2282_v14 = vpop.eup %2281 }
0x11bf   :  { %v2284_v45 = vpop.eup %2283  ;;  %v1292_v50 = vmul.f32 %v2282_v14, %v2669_v61 }
0x11c0   :  { %v1404_v53 = vmul.f32 %v2284_v45, %v2673_v0 }
0x121d   :  { %v1295_v43 = vpop.permute.xlu0 %1294 }
0x121e   :  { %v1297_v44 = vmul.f32 %v2282_v14, %v1295_v43 }
0x1220   :  { %1299 = vrot.lane.b32.xlu0 %v1297_v44, %s2322_s26 }
0x1223   :  { %v1407_v46 = vpop.permute.xlu1 %1406 }
0x1224   :  { %v1409_v47 = vmul.f32 %v2284_v45, %v1407_v46 }
0x1226   :  { %1411 = vrot.lane.b32.xlu1 %v1409_v47, %s2322_s26 }
0x1292   :  { %v1300_v51 = vpop.permute.xlu0 %1299 }
0x1293   :  { %v2712_v52 = vadd.f32 %v1300_v51, %v1292_v50 }
0x1295   :  { %2285 = vtanh.f32 %v2712_v52 }
0x1298   :  { %v1412_v20 = vpop.permute.xlu1 %1411 }
0x1299   :  { %v2716_v54 = vadd.f32 %v1412_v20, %v1404_v53  ;;  %v2315_v20 = vld [vmem:[%s2839_s4] sm:$0xff]  }
0x129b   :  { %2287 = vtanh.f32 %v2716_v54 }
0x129f   :  { %v2286_v56 = vpop.eup %2285 }
0x12a0   :  { %1305 = vrot.lane.b32.xlu0 %v2286_v56, %s2321_s3 }
0x12a5   :  { %v2288_v57 = vpop.eup %2287 }
0x12a6   :  { %1417 = vrot.lane.b32.xlu1 %v2288_v57, %s2321_s3 }
0x1312   :  { %v1306_v58 = vpop.permute.xlu0 %1305 }
0x1313   :  { %v2721_v59 = vmul.f32 %v2282_v14, %v1306_v58 }
0x1315   :  { %v1309_v16 = vpack.c.bf16 %v2721_v59, %v2721_v59 }
0x1317   :  { %1311 = vrot.lane.b32.xlu0 %v1309_v16, %s2322_s26 }
0x1318   :  { %v1418_v60 = vpop.permute.xlu1 %1417 }
0x1319   :  { %v1420_v61 = vmul.f32 %v2284_v45, %v1418_v60 }
0x131b   :  { %v1421_v62 = vpack.c.bf16 %v1420_v61, %v1420_v61 }
0x131d   :  { %1423 = vrot.lane.b32.xlu1 %v1421_v62, %s2322_s26 }
0x1389   :  { %v1312_v63 = vpop.permute.xlu0 %1311 }
0x138a   :  { %2109 = vmatmul.mubr.msk.bf16.vlgmr.msra.gmra.mrb[36].mxu0 %vm184_vm3, %v1312_v63 }
0x138b   :  { %2121 = vmatpush3.bf16.msra.mxu0 %v2459_v48  ;;  %2124 = vmatprep.mubr.msk.bf16.mxu0 %vm2319_vm2, %v2318_v4  ;;  %v2314_v48 = vld [vmem:[%s2837_s2 + $0x8] sm:$0xff]  }
0x138c   :  { %2122 = vmatprep.subr.bf16.mxu0 %v2318_v4 }
0x138f   :  { %2123 = vmatpush3.bf16.msra.mxu0 %v2465_v49  ;;  %v1424_v0 = vpop.permute.xlu1 %1423 }
0x1390   :  { %2136 = vmatprep.subr.bf16.mxu0 %v2318_v4 }
0x1392   :  { %2125 = vmatmul.mubr.msk.bf16.vlgmr.msra.gmra.mrb[40].mxu0 %vm184_vm3, %v1424_v0 }
0x1393   :  { %2137 = vmatpush3.bf16.msra.mxu0 %v2313_v25  ;;  %2140 = vmatprep.mubr.msk.bf16.mxu0 %vm2319_vm2, %v2318_v4 }
0x1394   :  { %2138 = vmatprep.subr.bf16.mxu0 %v2318_v4 }
0x1397   :  { %2139 = vmatpush3.bf16.msra.mxu0 %v2314_v48 }
0x139a   :  { %2141 = vmatmul.mubr.msk.bf16.vlgmr.msra.gmra.mrb[44].mxu0 %vm184_vm3, %v1424_v0 }
0x145d   :  { %v1350_v49 = vpop.f32.mrb[36].mxu0 }
0x145e   :  { %v2110_v1 = vpop.f32.mrb[37].mxu0 }
0x145f   :  { %v1353_v3 = vpop.f32.mrb[38].mxu0 }
0x1460   :  { %v2111_v7 = vpop.f32.mrb[39].mxu0 }
0x1465   :  { %v1462_v8 = vpop.f32.mrb[40].mxu0 }
0x1466   :  { %v1463_v22 = vadd.f32 %v1462_v8, %v1350_v49  ;;  %v2126_v10 = vpop.f32.mrb[41].mxu0 }
0x1467   :  { %v1465_v13 = vpop.f32.mrb[42].mxu0 }
0x1468   :  { %v1468_v15 = vadd.f32 %v2489_v55, %v1463_v22  ;;  %v2127_v9 = vpop.f32.mrb[43].mxu0  ;;  %v1677_v13 = vpack.c.bf16 %v2549_v30, %v2506_v37 }
0x1469   :  { %v1679_v9 = vpack.c.bf16 %v2721_v59, %v2678_v2  ;;  %v1678_v2 = vpack.c.bf16 %v2635_v12, %v2592_v23  ;;  %v14_v59 = vstv %s2842_s8 }
0x146a   :  { %2289 = vtanh.f32 %v1468_v15  ;;  %v1854_v28 = vmul.f32 -1.442695, %v1468_v15  ;;  %v2183_v15 = vld [vmem:[%s2841_s7] sm:$0xff]   ;;  %15 = vst [vmem:[#allocation2] sm:$0x1] %v14_v59 }
0x146b   :  { %2152 = vmatprep.subr.bf16.mxu0 %v2183_v15 }
0x146c   :  { %2153 = vmatpush3.bf16.msra.mxu0 %v2183_v15 }
0x146d   :  { %v1574_v17 = vpop.f32.mrb[44].mxu0 }
0x146e   :  { %v1580_v19 = vadd.f32 %v1574_v17, %v2441_v18  ;;  %v2142_v21 = vpop.f32.mrb[45].mxu0 }
0x146f   :  { %v1577_v11 = vpop.f32.mrb[46].mxu0 }
0x1470   :  { %2291 = vtanh.f32 %v1580_v19  ;;  %v2143_v24 = vpop.f32.mrb[47].mxu0  ;;  %v1857_v5 = vmul.f32 -1.442695, %v1580_v19  ;;  %v2184_v19 = vld [vmem:[%s2841_s7 + $0x8] sm:$0xff]  }
0x1471   :  { %2293 = vpow2.f32 %v1854_v28  ;;  %2154 = vmatprep.subr.bf16.mxu0 %v2184_v19  ;;  %v1860_v12 = vld [vmem:[#allocation2] ss:$0 sm:$0xff] }
0x1472   :  { %2295 = vpow2.f32 %v1857_v5  ;;  %2155 = vmatpush3.bf16.msra.mxu0 %v2184_v19 }
0x1474   :  { %v2290_v26 = vpop.eup %2289 }
0x1475   :  { %1478 = vrot.lane.b32.xlu0 %v2290_v26, %s2321_s3 }
0x147a   :  { %v2292_v27 = vpop.eup %2291 }
0x147b   :  { %1590 = vrot.lane.b32.xlu1 %v2292_v27, %s2321_s3  ;;  %v2294_v55 = vpop.eup %2293 }
0x147c   :  { %v1472_v29 = vadd.f32 1.0, %v2294_v55  ;;  %v2296_v31 = vpop.eup %2295 }
0x147d   :  { %v1584_v32 = vadd.f32 1.0, %v2296_v31 }
0x147e   :  { %2297 = vrcp.f32 %v1472_v29 }
0x147f   :  { %2299 = vrcp.f32 %v1584_v32 }
0x1488   :  { %v2298_v18 = vpop.eup %2297 }
0x1489   :  { %v2300_v34 = vpop.eup %2299  ;;  %v1476_v38 = vmul.f32 %v2298_v18, %v2712_v52 }
0x148a   :  { %v1588_v41 = vmul.f32 %v2300_v34, %v2716_v54  ;;  %v2316_v54 = vld [vmem:[%s2839_s4 + $0x8] sm:$0xff]  }
0x14e7   :  { %v1479_v33 = vpop.permute.xlu0 %1478 }
0x14e8   :  { %v1481_v6 = vmul.f32 %v2298_v18, %v1479_v33 }
0x14ea   :  { %1483 = vrot.lane.b32.xlu0 %v1481_v6, %s2322_s26 }
0x14ed   :  { %v1591_v35 = vpop.permute.xlu1 %1590 }
0x14ee   :  { %v1593_v36 = vmul.f32 %v2300_v34, %v1591_v35 }
0x14f0   :  { %1595 = vrot.lane.b32.xlu1 %v1593_v36, %s2322_s26 }
0x155c   :  { %v1484_v39 = vpop.permute.xlu0 %1483 }
0x155d   :  { %v1486_v40 = vadd.f32 %v1484_v39, %v1476_v38 }
0x155f   :  { %2301 = vtanh.f32 %v1486_v40 }
0x1562   :  { %v1596_v42 = vpop.permute.xlu1 %1595 }
0x1563   :  { %v1598_v14 = vadd.f32 %v1596_v42, %v1588_v41 }
0x1565   :  { %2303 = vtanh.f32 %v1598_v14 }
0x1569   :  { %v2302_v43 = vpop.eup %2301 }
0x156a   :  { %1489 = vrot.lane.b32.xlu0 %v2302_v43, %s2321_s3 }
0x156f   :  { %v2304_v44 = vpop.eup %2303 }
0x1570   :  { %1601 = vrot.lane.b32.xlu1 %v2304_v44, %s2321_s3 }
0x15dc   :  { %v1490_v45 = vpop.permute.xlu0 %1489 }
0x15dd   :  { %v2755_v46 = vmul.f32 %v2298_v18, %v1490_v45 }
0x15df   :  { %v1493_v47 = vpack.c.bf16 %v2755_v46, %v2755_v46 }
0x15e1   :  { %1495 = vrot.lane.b32.xlu0 %v1493_v47, %s2322_s26 }
0x15e2   :  { %v1602_v50 = vpop.permute.xlu1 %1601 }
0x15e3   :  { %v1604_v51 = vmul.f32 %v2300_v34, %v1602_v50 }
0x15e5   :  { %v1605_v52 = vpack.c.bf16 %v1604_v51, %v1604_v51 }
0x15e7   :  { %1607 = vrot.lane.b32.xlu1 %v1605_v52, %s2322_s26 }
0x1653   :  { %v1496_v53 = vpop.permute.xlu0 %1495 }
0x1654   :  { %2133 = vmatmul.mubr.msk.bf16.vlgmr.msra.gmra.mrb[48].mxu1 %vm184_vm3, %v1496_v53 }
0x1655   :  { %2145 = vmatpush3.bf16.msra.mxu1 %v2315_v20  ;;  %2148 = vmatprep.mubr.msk.bf16.mxu1 %vm2319_vm2, %v2318_v4 }
0x1656   :  { %2146 = vmatprep.subr.bf16.mxu1 %v2318_v4  ;;  %v2317_v4 = vld [vmem:[%s2840_s6] ss:$0 sm:$0xff] }
0x1659   :  { %2147 = vmatpush3.bf16.msra.mxu1 %v2316_v54  ;;  %v1608_v56 = vpop.permute.xlu1 %1607 }
0x165c   :  { %2149 = vmatmul.mubr.msk.bf16.vlgmr.msra.gmra.mrb[52].mxu1 %vm184_vm3, %v1608_v56 }
0x1727   :  { %v1534_v57 = vpop.f32.mrb[48].mxu1 }
0x1728   :  { %v2134_v58 = vpop.f32.mrb[49].mxu1 }
0x1729   :  { %v1537_v16 = vpop.f32.mrb[50].mxu1 }
0x172a   :  { %v2135_v60 = vpop.f32.mrb[51].mxu1 }
0x172f   :  { %v1646_v61 = vpop.f32.mrb[52].mxu1 }
0x1730   :  { %v1647_v62 = vadd.f32 %v1646_v61, %v1534_v57  ;;  %v2150_v63 = vpop.f32.mrb[53].mxu1 }
0x1731   :  { %v1649_v0 = vpop.f32.mrb[54].mxu1 }
0x1732   :  { %v1652_v25 = vadd.f32 %v2317_v4, %v1647_v62  ;;  %v2151_v48 = vpop.f32.mrb[55].mxu1 }
0x1734   :  { %2305 = vtanh.f32 %v1652_v25  ;;  %v1859_v1 = vmul.f32 -1.442695, %v1652_v25 }
0x1736   :  { %2307 = vpow2.f32 %v1859_v1 }
0x173e   :  { %v2306_v49 = vpop.eup %2305 }
0x173f   :  { %1662 = vrot.lane.b32.xlu0 %v2306_v49, %s2321_s3 }
0x1740   :  { %v2308_v3 = vpop.eup %2307 }
0x1741   :  { %v1656_v7 = vadd.f32 1.0, %v2308_v3 }
0x1743   :  { %2309 = vrcp.f32 %v1656_v7 }
0x174d   :  { %v2310_v8 = vpop.eup %2309 }
0x174e   :  { %v1660_v17 = vmul.f32 %v2310_v8, %v1486_v40 }
0x17b1   :  { %v1663_v22 = vpop.permute.xlu0 %1662 }
0x17b2   :  { %v1665_v10 = vmul.f32 %v2310_v8, %v1663_v22 }
0x17b4   :  { %1667 = vrot.lane.b32.xlu1 %v1665_v10, %s2322_s26 }
0x17b8   :  { %1696 = vrot.lane.b32.xlu1 %v1677_v13, %s2322_s26 }
0x17bc   :  { %1700 = vrot.lane.b32.xlu1 %v1679_v9, %s2322_s26 }
0x1826   :  { %v1668_v21 = vpop.permute.xlu1 %1667 }
0x1827   :  { %v1670_v37 = vadd.f32 %v1668_v21, %v1660_v17 }
0x1829   :  { %2311 = vtanh.f32 %v1670_v37 }
0x182a   :  { %v1697_v30 = vpop.permute.xlu1 %1696 }
0x182b   :  { %2156 = vmatprep.mubr.msk.bf16.mxu0 %vm184_vm3, %v1697_v30 }
0x182e   :  { %v1701_v5 = vpop.permute.xlu1 %1700 }
0x1833   :  { %v2312_v11 = vpop.eup %2311 }
0x1834   :  { %1673 = vrot.lane.b32.xlu0 %v2312_v11, %s2321_s3 }
0x1838   :  { %1698 = vrot.lane.b32.xlu0 %v1678_v2, %s2322_s26 }
0x18a6   :  { %v1674_v24 = vpop.permute.xlu0 %1673 }
0x18a7   :  { %v1676_v26 = vmul.f32 %v2310_v8, %v1674_v24 }
0x18a9   :  { %v1680_v27 = vpack.c.bf16 %v1676_v26, %v2755_v46 }
0x18aa   :  { %v1699_v28 = vpop.permute.xlu0 %1698 }
0x18ab   :  { %1702 = vrot.lane.b32.xlu0 %v1680_v27, %s2322_s26  ;;  %2157 = vmatmul.mubr.msk.bf16.vlgmr.msra.gmra.mrb[48].mxu0 %vm184_vm3, %v1699_v28 }
0x18ac   :  { %2160 = vmatprep.mubr.msk.bf16.mxu0 %vm184_vm3, %v1701_v5 }
0x191d   :  { %v1703_v23 = vpop.permute.xlu0 %1702 }
0x191e   :  { %2161 = vmatmul.mubr.msk.bf16.gmra.mrb[52].mxu0 %vm184_vm3, %v1703_v23 }
0x197e   :  { %v2158_v55 = vpop.f32.mrb[48].mxu0 }
0x197f   :  { %v1771_v29 = vadd.f32 %v2158_v55, %v1860_v12  ;;  %v1762_v31 = vpop.f32.mrb[49].mxu0 }
0x1980   :  { %v1763_v32 = vadd.f32 %v1860_v12, %v1762_v31  ;;  %v2159_v18 = vpop.f32.mrb[50].mxu0 }
0x1981   :  { %1796 = vst.msk [vmem:[%s2843_s9 + $0x10] sm:$0xff] %vm1793_vm4, %v1771_v29  ;;  %v1774_v33 = vadd.f32 %v2159_v18, %v1860_v12  ;;  %v1765_v6 = vpop.f32.mrb[51].mxu0 }
0x1982   :  { %1794 = vst.msk [vmem:[%s2843_s9] sm:$0xff] %vm1793_vm4, %v1763_v32  ;;  %v1766_v34 = vadd.f32 %v1860_v12, %v1765_v6 }
0x1983   :  { %1797 = vst.msk [vmem:[%s2843_s9 + $0x18] sm:$0xff] %vm1793_vm4, %v1774_v33 }
0x1984   :  { %1795 = vst.msk [vmem:[%s2843_s9 + $0x8] sm:$0xff] %vm1793_vm4, %v1766_v34 }
0x19f1   :  { %v2162_v35 = vpop.f32.mrb[52].mxu0 }
0x19f2   :  { %v1787_v36 = vadd.f32 %v2162_v35, %v1860_v12  ;;  %v1778_v38 = vpop.f32.mrb[53].mxu0 }
0x19f3   :  { %v1779_v39 = vadd.f32 %v1860_v12, %v1778_v38  ;;  %v2163_v40 = vpop.f32.mrb[54].mxu0 }
0x19f4   :  { %1800 = vst.msk [vmem:[%s2843_s9 + $0x30] sm:$0xff] %vm1793_vm4, %v1787_v36  ;;  %v1790_v41 = vadd.f32 %v2163_v40, %v1860_v12  ;;  %v1781_v42 = vpop.f32.mrb[55].mxu0 }
0x19f5   :  { %1798 = vst.msk [vmem:[%s2843_s9 + $0x20] sm:$0xff] %vm1793_vm4, %v1779_v39  ;;  %v1782_v14 = vadd.f32 %v1860_v12, %v1781_v42 }
0x19f6   :  { %1801 = vst.msk [vmem:[%s2843_s9 + $0x38] sm:$0xff] %vm1793_vm4, %v1790_v41 }
0x19f7   :  { %1799 = vst.msk [vmem:[%s2843_s9 + $0x28] sm:$0xff] %vm1793_vm4, %v1782_v14 }

</bundles_post_ra>
